<compile_context>
chip_gen: v7x
topology: tpu7x:2x2x1
jax: 0.10.0
libtpu: 0.0.40
codegen_flags: <defaults>
</compile_context>

<pallas_src>
import functools

import jax
import jax.numpy as jnp
from jax import lax
from jax.experimental import pallas as pl
from jax.experimental.pallas import tpu as pltpu


def _round_up(x, m):
    return (x + m - 1) // m * m


def _device_kind():
    try:
        return jax.devices()[0].device_kind.lower()
    except Exception:
        return ""


def _use_bf16_epilogue_default():
    # bf16 VALU exists on v6e / v7x; keep the ReLU epilogue in f32 on older parts (v5e...).
    kind = _device_kind()
    return not any(t in kind for t in ("v2", "v3", "v4", "v5"))


def _default_block_batch():
    # v7x has 64 MiB physical VMEM -> cap the batch tile at 2048 lanes; v5e/v6e take 4096.
    kind = _device_kind()
    return 2048 if "7" in kind else 4096


# ----------------------------------------------------------------------------- kernel
def _critic_kernel(x_ref, w1_ref, b1_ref, w2_ref, w3_ref, out_ref, *, bf16_epilogue):
    # x_ref : (Bb, S)    f32   -- activation tile (batch on sublanes, features on lanes)
    # w1_ref: (H1p, S)   f32   -- layer-1 weights (constant-1 channel row is all-zero)
    # b1_ref: (H1p, 1)   f32   -- layer-1 bias (constant-1 channel entry == 1)
    # w2_ref: (H2p, H1p) bf16  -- layer-2 weights, b2 folded into the constant-1 column
    # w3_ref: (1, H2p)   bf16  -- layer-3 weights, b3 folded into the constant-1 column
    # out_ref: (1, Bb)   f32   -- lane-dense value row

    # ---- layer 1: f32 NT matmul (contract the lane dims of both operands).  K = S is
    # tiny, so full f32 precision costs nothing and no host transpose/cast is needed.
    acc1 = lax.dot_general(
        w1_ref[...], x_ref[...], (((1,), (1,)), ((), ())),
        preferred_element_type=jnp.float32,
        precision=lax.Precision.HIGHEST)                                  # (H1p, Bb)
    if bf16_epilogue:   # v6e / v7x: bias + ReLU on the bf16 VALU (half the vregs)
        h1 = jnp.maximum(acc1.astype(jnp.bfloat16)
                         + b1_ref[...].astype(jnp.bfloat16), 0)
    else:               # v5e: no bf16 VALU -> keep the epilogue in f32
        h1 = jnp.maximum(acc1 + b1_ref[...], 0.0).astype(jnp.bfloat16)    # (H1p, Bb)

    # ---- layer 2: bf16 MXU matmul, f32 accumulation; b2 rides on the constant-1 column.
    acc2 = jnp.dot(w2_ref[...], h1, preferred_element_type=jnp.float32)   # (H2p, Bb)
    if bf16_epilogue:
        h2 = jnp.maximum(acc2.astype(jnp.bfloat16), 0)
    else:
        h2 = jnp.maximum(acc2, 0.0).astype(jnp.bfloat16)                  # (H2p, Bb)

    # ---- layer 3: (1, H2p) x (H2p, Bb) on the MXU -> already a lane-dense (1, Bb) row;
    # b3 rides on the constant-1 column.  MXU has slack after layer 2 on every chip.
    out_ref[...] = jnp.dot(w3_ref[...], h2,
                           preferred_element_type=jnp.float32).astype(out_ref.dtype)


# ---------------------------------------------------------------------------- wrapper
def _padded_vmem_bytes(shape, itemsize, sublane):
    r, c = (1, shape[0]) if len(shape) == 1 else shape[-2:]
    return _round_up(r, sublane) * _round_up(c, 128) * itemsize


@functools.partial(jax.jit, static_argnames=("block_batch", "bf16_epilogue"))
def _critic_forward(state, w1p, b1p, w2p, w3p, *, block_batch, bf16_epilogue):
    batch, s_dim = state.shape
    h1p = w1p.shape[0]
    h2p = w2p.shape[0]

    # Batch tiling: batch is the lane axis of the output, so tiles are 128-lane multiples
    # (or the full batch when it fits one small block).
    if batch <= block_batch:
        if batch > 128:
            # split into 2 balanced blocks so the "parallel" axis feeds both v7x cores
            bb = _round_up((batch + 1) // 2, 128)
            padded = 2 * bb
        else:
            bb, padded = batch, batch
    else:
        bb = _round_up(min(block_batch, batch), 128)
        padded = _round_up(batch, bb)
    n_blocks = padded // bb

    x = state if padded == batch else jnp.pad(state, ((0, padded - batch), (0, 0)))

    # VMEM budget from lane/sublane-padded footprints (double-buffered pipelined operands
    # + f32/bf16 intermediates), capped at 48 MiB so v7x keeps compiler-scratch headroom.
    f32b, bf16b = 4, 2
    resident = (_padded_vmem_bytes(w1p.shape, f32b, 8)
                + _padded_vmem_bytes(b1p.shape, f32b, 8)
                + _padded_vmem_bytes(w2p.shape, bf16b, 16)
                + _padded_vmem_bytes(w3p.shape, bf16b, 16))
    per_tile = (_padded_vmem_bytes((bb, s_dim), f32b, 8)
                + _padded_vmem_bytes((1, bb), f32b, 8))
    inter = (_padded_vmem_bytes((h1p, bb), f32b, 8)
             + _padded_vmem_bytes((h1p, bb), bf16b, 16)
             + _padded_vmem_bytes((h2p, bb), f32b, 8)
             + _padded_vmem_bytes((h2p, bb), bf16b, 16))
    est = 2 * (resident + per_tile) + inter
    vmem_limit = int(min(48 << 20, max(8 << 20, (3 * est) // 2)))

    kernel = functools.partial(_critic_kernel, bf16_epilogue=bf16_epilogue)
    out = pl.pallas_call(
        kernel,
        out_shape=jax.ShapeDtypeStruct((1, padded), jnp.float32),
        grid=(n_blocks,),
        in_specs=[
            pl.BlockSpec((bb, s_dim), lambda i: (i, 0)),   # activations: pipelined tiles
            pl.BlockSpec(w1p.shape, lambda i: (0, 0)),     # weights: DMA'd once, resident
            pl.BlockSpec(b1p.shape, lambda i: (0, 0)),
            pl.BlockSpec(w2p.shape, lambda i: (0, 0)),
            pl.BlockSpec(w3p.shape, lambda i: (0, 0)),
        ],
        out_specs=pl.BlockSpec((1, bb), lambda i: (0, i)),  # lane-dense output row
        compiler_params=pltpu.CompilerParams(
            dimension_semantics=("parallel",),              # shard tiles across TCs
            vmem_limit_bytes=vmem_limit,
        ),
    )(x, w1p, b1p, w2p, w3p)

    return out[0, :batch][:, None]                           # (batch, 1)


def critic_forward(state, params, block_batch=None, bf16_epilogue=None):
    """state: (batch, state_dim) f32; params from prepare_params.
    Returns (batch, 1) f32 — same semantics as CriticNetwork.forward."""
    if block_batch is None:
        block_batch = _default_block_batch()
    if bf16_epilogue is None:
        bf16_epilogue = _use_bf16_epilogue_default()
    return _critic_forward(state, *params, block_batch=int(block_batch),
                           bf16_epilogue=bool(bf16_epilogue))


# ------------------------------------------------------------------------------ params
def init_critic_params(key, state_dim, hidden_1=400, hidden_2=200):
    """Orthogonal init with gain=sqrt(2) (torch 'relu' gain), zero biases — mirrors
    orthogonal_init.  Weights in PyTorch nn.Linear layout: (out_features, in_features)."""
    gain = float(jnp.sqrt(2.0))
    k1, k2, k3 = jax.random.split(key, 3)
    ortho = jax.nn.initializers.orthogonal(scale=gain)
    w1 = ortho(k1, (hidden_1, state_dim), jnp.float32)
    b1 = jnp.zeros((hidden_1,), jnp.float32)
    w2 = ortho(k2, (hidden_2, hidden_1), jnp.float32)
    b2 = jnp.zeros((hidden_2,), jnp.float32)
    w3 = ortho(k3, (1, hidden_2), jnp.float32)
    b3 = jnp.zeros((1,), jnp.float32)
    return w1, b1, w2, b2, w3, b3


def prepare_params(w1, b1, w2, b2, w3, b3):
    """Host-side prep for the kernel layout:
      * hidden dims padded to the bf16 sublane granule (16): 400 -> 416, 200 -> 208,
        each including one extra constant-1 channel,
      * b2 folded into w2's constant-1 column, b3 into w3's constant-1 column,
      * w1/b1 stay f32 (K = state_dim is tiny); w2/w3 cast to bf16."""
    h1, s = w1.shape
    h2 = w2.shape[0]
    c1, c2 = h1, h2                                 # indices of the constant-1 channels
    h1p = _round_up(h1 + 1, 16)
    h2p = _round_up(h2 + 1, 16)

    w1p = jnp.zeros((h1p, s), jnp.float32).at[:h1, :].set(w1)
    b1p = (jnp.zeros((h1p, 1), jnp.float32)
           .at[:h1, 0].set(b1)
           .at[c1, 0].set(1.0))                     # h1[c1] == relu(0 + 1) == 1

    w2p = (jnp.zeros((h2p, h1p), jnp.float32)
           .at[:h2, :h1].set(w2)
           .at[:h2, c1].set(b2)                     # bias-2 rides on the constant channel
           .at[c2, c1].set(1.0)                     # h2[c2] == relu(1 * 1) == 1
           ).astype(jnp.bfloat16)

    b3s = jnp.asarray(b3, jnp.float32).reshape(-1)[0]
    w3p = (jnp.zeros((1, h2p), jnp.float32)
           .at[0, :h2].set(w3.reshape(-1))
           .at[0, c2].set(b3s)                      # bias-3 rides on the constant channel
           ).astype(jnp.bfloat16)
    return w1p, b1p, w2p, w3p


# -------------------------------------------------------------------------- references
def _mm(a, b):
    return jnp.dot(a, b, precision=lax.Precision.HIGHEST)


def critic_reference_f32(state, w1, b1, w2, b2, w3, b3):
    """Pure-f32 reference in PyTorch layout (y = x @ W.T + b)."""
    h1 = jax.nn.relu(_mm(state, w1.T) + b1)
    h2 = jax.nn.relu(_mm(h1, w2.T) + b2)
    return _mm(h2, w3.T) + b3


def critic_reference_prepared(state, w1p, b1p, w2p, w3p, *, bf16_epilogue):
    """Reference using the kernel's operand layout / cast points."""
    f32, bf16 = jnp.float32, jnp.bfloat16
    acc1 = _mm(state.astype(f32), w1p.T)                               # f32 layer 1
    if bf16_epilogue:
        h1 = jnp.maximum(acc1.astype(bf16) + b1p[:, 0].astype(bf16), 0)
    else:
        h1 = jnp.maximum(acc1 + b1p[:, 0], 0.0).astype(bf16)
    acc2 = _mm(h1.astype(f32), w2p.astype(f32).T)
    if bf16_epilogue:
        h2 = jnp.maximum(acc2.astype(bf16), 0)
    else:
        h2 = jnp.maximum(acc2, 0.0).astype(bf16)
    return _mm(h2.astype(f32), w3p.astype(f32).T)                      # (B, 1)


# --------------------------------------------------------------------------------- main
if __name__ == "__main__":
    key = jax.random.PRNGKey(0)
    k_state, k_state2, k_params = jax.random.split(key, 3)

    state_dim = 8                                    # action_dim is unused by the critic
    params = init_critic_params(k_params, state_dim)    # PyTorch-layout f32 params
    kparams = prepare_params(*params)                    # folded / padded kernel layout

    def check(state, **kw):
        out = jax.block_until_ready(critic_forward(state, kparams, **kw))
        assert out.shape == (state.shape[0], 1), out.shape
        bf16_ep = kw.get("bf16_epilogue")
        if bf16_ep is None:
            bf16_ep = _use_bf16_epilogue_default()
        ref_p = critic_reference_prepared(state, *kparams, bf16_epilogue=bf16_ep)
        assert jnp.allclose(out, ref_p, atol=2e-2, rtol=2e-2), (out, ref_p)
        ref = critic_reference_f32(state, *params)
        tol = 5e-2 * (1.0 + float(jnp.max(jnp.abs(ref))))
        assert float(jnp.max(jnp.abs(out - ref))) <= tol, (out, ref)
        return out

    # Small batch: single tile (overhead-bound RL regime).
    check(jax.random.normal(k_state, (8, state_dim), jnp.float32))

    # Mid batch with the default tile: 2-block split (feeds both v7x cores), 300 -> 512.
    state2 = jax.random.normal(k_state2, (300, state_dim), jnp.float32)
    check(state2)

    # Forced small tile: 3-block grid, exercises the general tiling / batch-padding path.
    check(state2, block_batch=128)

    print("KERNEL_OK")
</pallas_src>

<mosaic_0001>
module attributes {stable_mosaic.version = 11 : i64} {
  func.func @_critic_kernel(%arg0: i32, %arg1: memref<8x8xf32, #tpu.memory_space<vmem>>, %arg2: memref<416x8xf32, #tpu.memory_space<vmem>>, %arg3: memref<416x1xf32, #tpu.memory_space<vmem>>, %arg4: memref<208x416xbf16, #tpu.memory_space<vmem>>, %arg5: memref<1x208xbf16, #tpu.memory_space<vmem>>, %arg6: memref<1x8xf32, #tpu.memory_space<vmem>>) attributes {dimension_semantics = [#tpu.dimension_semantics<parallel>], iteration_bounds = array<i64: 1>, scalar_prefetch = 0 : i64, scratch_operands = 0 : i64, tpu.core_type = #tpu.core_type<tc>, window_params = [{transform_indices = @transform_0, window_bounds = array<i64: 8, 8>}, {pipeline_mode = #tpu.pipeline_mode<synchronous>, transform_indices = @transform_1, window_bounds = array<i64: 416, 8>}, {pipeline_mode = #tpu.pipeline_mode<synchronous>, transform_indices = @transform_2, window_bounds = array<i64: 416, 1>}, {pipeline_mode = #tpu.pipeline_mode<synchronous>, transform_indices = @transform_3, window_bounds = array<i64: 208, 416>}, {pipeline_mode = #tpu.pipeline_mode<synchronous>, transform_indices = @transform_4, window_bounds = array<i64: 1, 208>}, {transform_indices = @transform_5, window_bounds = array<i64: 1, 8>}]} {
    %c0 = arith.constant 0 : index
    %c0_0 = arith.constant 0 : index
    %0 = vector.load %arg2[%c0, %c0_0] : memref<416x8xf32, #tpu.memory_space<vmem>>, vector<416x8xf32>
    %c0_1 = arith.constant 0 : index
    %c0_2 = arith.constant 0 : index
    %1 = vector.load %arg1[%c0_1, %c0_2] : memref<8x8xf32, #tpu.memory_space<vmem>>, vector<8x8xf32>
    %cst = arith.constant dense<0.000000e+00> : vector<416x8xf32>
    %2 = tpu.matmul %0, %1, %cst {dimension_numbers = #tpu.dot_dimension_numbers<[1], [1], [0], [0], [0, 0, 1, 0], [], []>, precision = #tpu.contract_precision<fp32>} : vector<416x8xf32>, vector<8x8xf32>, vector<416x8xf32> -> vector<416x8xf32>
    %3 = arith.truncf %2 : vector<416x8xf32> to vector<416x8xbf16>
    %c0_3 = arith.constant 0 : index
    %c0_4 = arith.constant 0 : index
    %4 = vector.load %arg3[%c0_3, %c0_4] : memref<416x1xf32, #tpu.memory_space<vmem>>, vector<416x1xf32>
    %5 = arith.truncf %4 : vector<416x1xf32> to vector<416x1xbf16>
    %6 = vector.broadcast %5 : vector<416x1xbf16> to vector<416x8xbf16>
    %7 = arith.addf %3, %6 : vector<416x8xbf16>
    %cst_5 = arith.constant 0.000000e+00 : bf16
    %8 = vector.broadcast %cst_5 : bf16 to vector<416x8xbf16>
    %9 = arith.maximumf %7, %8 : vector<416x8xbf16>
    %c0_6 = arith.constant 0 : index
    %c0_7 = arith.constant 0 : index
    %10 = vector.load %arg4[%c0_6, %c0_7] : memref<208x416xbf16, #tpu.memory_space<vmem>>, vector<208x416xbf16>
    %cst_8 = arith.constant dense<0.000000e+00> : vector<208x8xf32>
    %11 = tpu.matmul %10, %9, %cst_8 {dimension_numbers = #tpu.dot_dimension_numbers<[1], [0], [0], [1], [0, 0, 1, 1], [], []>} : vector<208x416xbf16>, vector<416x8xbf16>, vector<208x8xf32> -> vector<208x8xf32>
    %12 = arith.truncf %11 : vector<208x8xf32> to vector<208x8xbf16>
    %cst_9 = arith.constant 0.000000e+00 : bf16
    %13 = vector.broadcast %cst_9 : bf16 to vector<208x8xbf16>
    %14 = arith.maximumf %12, %13 : vector<208x8xbf16>
    %c0_10 = arith.constant 0 : index
    %c0_11 = arith.constant 0 : index
    %15 = vector.load %arg5[%c0_10, %c0_11] : memref<1x208xbf16, #tpu.memory_space<vmem>>, vector<1x208xbf16>
    %cst_12 = arith.constant dense<0.000000e+00> : vector<1x8xf32>
    %16 = tpu.matmul %15, %14, %cst_12 {dimension_numbers = #tpu.dot_dimension_numbers<[1], [0], [0], [1], [0, 0, 1, 1], [], []>} : vector<1x208xbf16>, vector<208x8xbf16>, vector<1x8xf32> -> vector<1x8xf32>
    %c0_13 = arith.constant 0 : index
    %c0_14 = arith.constant 0 : index
    %17 = vector.load %arg6[%c0_13, %c0_14] : memref<1x8xf32, #tpu.memory_space<vmem>>, vector<1x8xf32>
    tpu.vector_store %arg6[%c0_13, %c0_14], %16 {strides = array<i32>} : memref<1x8xf32, #tpu.memory_space<vmem>>, vector<1x8xf32>,
    return
  }
  func.func @transform_0(%arg0: i32) -> (i32, i32) {
    %c0_i32 = arith.constant 0 : i32
    %c0_i32_0 = arith.constant 0 : i32
    return %arg0, %c0_i32 : i32, i32
  }
  func.func @transform_1(%arg0: i32) -> (i32, i32) {
    %c0_i32 = arith.constant 0 : i32
    %c0_i32_0 = arith.constant 0 : i32
    %c0_i32_1 = arith.constant 0 : i32
    return %c0_i32, %c0_i32_0 : i32, i32
  }
  func.func @transform_2(%arg0: i32) -> (i32, i32) {
    %c0_i32 = arith.constant 0 : i32
    %c0_i32_0 = arith.constant 0 : i32
    %c0_i32_1 = arith.constant 0 : i32
    return %c0_i32, %c0_i32_0 : i32, i32
  }
  func.func @transform_3(%arg0: i32) -> (i32, i32) {
    %c0_i32 = arith.constant 0 : i32
    %c0_i32_0 = arith.constant 0 : i32
    %c0_i32_1 = arith.constant 0 : i32
    return %c0_i32, %c0_i32_0 : i32, i32
  }
  func.func @transform_4(%arg0: i32) -> (i32, i32) {
    %c0_i32 = arith.constant 0 : i32
    %c0_i32_0 = arith.constant 0 : i32
    %c0_i32_1 = arith.constant 0 : i32
    return %c0_i32, %c0_i32_0 : i32, i32
  }
  func.func @transform_5(%arg0: i32) -> (i32, i32) {
    %c0_i32 = arith.constant 0 : i32
    %c0_i32_0 = arith.constant 0 : i32
    return %c0_i32, %arg0 : i32, i32
  }
}

</mosaic_0001>

<bundles_post_ra>
// kernel: _critic_forward.1
= control target key start
LH: loop header
LB: loop body
LE: loop exit
PB: predicated region body
PF: predicated region fallthrough
CT: control target
= control target key end

     0   :  { %vm75_vm0 = vcmask 64512   ;;  %s6958_s0 = inlined_call_operand.vmem [shape: f32[8,8], index: 0, kind: input, shape index: {}]   ;;  %s6959_s1 = inlined_call_operand.vmem [shape: f32[416,8], index: 1, kind: input, shape index: {}]   ;;  %s6960_s2 = inlined_call_operand.vmem [shape: f32[416,1], index: 2, kind: input, shape index: {}]   ;;  %s6961_s3 = inlined_call_operand.vmem [shape: bf16[208,416], index: 3, kind: input, shape index: {}]   ;;  %s6962_s4 = inlined_call_operand.vmem [shape: bf16[1,208], index: 4, kind: input, shape index: {}]   ;;  %s6963_s5 = inlined_call_operand.hbm [shape: f32[1,8], index: 5, kind: output, shape index: {}]  }
   0x1   :  { %v74_v0 = vld [vmem:[%s6958_s0] sm:$0xff]  ;;  %v23_v8 = vld [vmem:[%s6959_s1 + $0x8] sm:$0xff]  ;;  %v24_v12 = vld [vmem:[%s6959_s1 + $0x10] sm:$0xff] }
   0x2   :  { %v22_v1 = vld [vmem:[%s6959_s1] sm:$0xff]  ;;  %v233_v2 = vsel %vm75_vm0, %v74_v0, 0  ;;  %v80_v10 = vsel %vm75_vm0, %v23_v8, 0  ;;  %v83_v15 = vsel %vm75_vm0, %v24_v12, 0  ;;  %v25_v16 = vld [vmem:[%s6959_s1 + $0x18] sm:$0xff]  ;;  %v27_v21 = vld [vmem:[%s6959_s1 + $0x28] sm:$0xff] }
   0x3   :  { %v77_v3 = vsel %vm75_vm0, %v22_v1, 0  ;;  %v5253_v4 = vand.u32 4294901760, %v233_v2  ;;  %v5274_v13 = vand.u32 4294901760, %v80_v10  ;;  %v26_v17 = vld [vmem:[%s6959_s1 + $0x20] sm:$0xff]  ;;  %v5290_v18 = vand.u32 4294901760, %v83_v15  ;;  %v28_v22 = vld [vmem:[%s6959_s1 + $0x30] sm:$0xff] }
   0x4   :  { %v5255_v5 = vand.u32 4294901760, %v77_v3  ;;  %v86_v19 = vsel %vm75_vm0, %v25_v16, 0  ;;  %v89_v20 = vsel %vm75_vm0, %v26_v17, 0  ;;  %v29_v25 = vld [vmem:[%s6959_s1 + $0x38] sm:$0xff]  ;;  %v92_v28 = vsel %vm75_vm0, %v27_v21, 0  ;;  %v30_v29 = vld [vmem:[%s6959_s1 + $0x40] sm:$0xff] }
   0x5   :  { %v823_v6 = vsub.f32 %v233_v2, %v5253_v4  ;;  %4363 = vmatprep.subr.mxu1 %v5253_v4  ;;  %7093 = vst [vmem:[#allocation6_spill] sm:$0xff] %v5274_v13  ;;  %v5302_v23 = vsub.f32 %v80_v10, %v5274_v13  ;;  %v5304_v24 = vand.u32 4294901760, %v86_v19  ;;  %v5310_v26 = vsub.f32 %v83_v15, %v5290_v18  ;;  %v31_v33 = vld [vmem:[%s6959_s1 + $0x48] sm:$0xff]  ;;  %v32_v37 = vld [vmem:[%s6959_s1 + $0x50] sm:$0xff]  ;;  %v33_v41 = vld [vmem:[%s6959_s1 + $0x58] sm:$0xff] }
   0x6   :  { %7092 = vst [vmem:[#allocation5_spill] sm:$0xff] %v5255_v5  ;;  %4445 = vmatprep.mubr.f32.mxu0 %v5255_v5  ;;  %4364 = vmatpush3.xpose.msra.mxu1 %v5253_v4  ;;  %v5279_v14 = vsub.f32 %v77_v3, %v5255_v5  ;;  %v5312_v27 = vand.u32 4294901760, %v89_v20  ;;  %v95_v30 = vsel %vm75_vm0, %v28_v22, 0  ;;  %v5323_v32 = vand.u32 4294901760, %v92_v28  ;;  %v34_v45 = vld [vmem:[%s6959_s1 + $0x60] sm:$0xff]  ;;  %v35_v47 = vld [vmem:[%s6959_s1 + $0x68] sm:$0xff] }
   0x7   :  { %v5261_v7 = vand.u32 4294901760, %v823_v6  ;;  %v5321_v31 = vsub.f32 %v86_v19, %v5304_v24  ;;  %v5332_v35 = vand.u32 4294901760, %v95_v30  ;;  %v98_v36 = vsel %vm75_vm0, %v29_v25, 0  ;;  %v36_v50 = vld [vmem:[%s6959_s1 + $0x70] sm:$0xff]  ;;  %v37_v61 = vld [vmem:[%s6959_s1 + $0x78] sm:$0xff]  ;;  %v38_v62 = vld [vmem:[%s6959_s1 + $0x80] sm:$0xff] }
   0x8   :  { %v5330_v34 = vsub.f32 %v89_v20, %v5312_v27  ;;  %v101_v38 = vsel %vm75_vm0, %v30_v29, 0  ;;  %v5343_v39 = vsub.f32 %v92_v28, %v5323_v32  ;;  %v5345_v40 = vand.u32 4294901760, %v98_v36 }
   0x9   :  { %v825_v9 = vsub.f32 %v823_v6, %v5261_v7  ;;  %v5352_v42 = vsub.f32 %v95_v30, %v5332_v35  ;;  %v5354_v43 = vand.u32 4294901760, %v101_v38  ;;  %v104_v44 = vsel %vm75_vm0, %v31_v33, 0 }
   0xa   :  { %v107_v46 = vsel %vm75_vm0, %v32_v37, 0  ;;  %v5366_v48 = vsub.f32 %v98_v36, %v5345_v40  ;;  %v5368_v49 = vand.u32 4294901760, %v104_v44  ;;  %v110_v53 = vsel %vm75_vm0, %v33_v41, 0 }
   0xb   :  { %v5268_v11 = vand.u32 4294901760, %v825_v9  ;;  %v5375_v51 = vsub.f32 %v101_v38, %v5354_v43  ;;  %v5377_v52 = vand.u32 4294901760, %v107_v46  ;;  %v113_v54 = vsel %vm75_vm0, %v34_v45, 0 }
   0xc   :  { %v116_v55 = vsel %vm75_vm0, %v35_v47, 0  ;;  %v5384_v56 = vsub.f32 %v104_v44, %v5368_v49  ;;  %v5386_v57 = vand.u32 4294901760, %v110_v53  ;;  %v5392_v59 = vand.u32 4294901760, %v113_v54 }
   0xd   :  { %4443 = vmatprep.subr.mxu0 %v5268_v11  ;;  %4843 = vmatprep.subr.mxu1 %v5268_v11  ;;  %7094 = vst [vmem:[#allocation7_spill] sm:$0xff] %v5377_v52  ;;  %v5390_v58 = vsub.f32 %v107_v46, %v5377_v52  ;;  %v119_v60 = vsel %vm75_vm0, %v36_v50, 0 }
   0xe   :  { %4444 = vmatpush3.xpose.msra.mxu0 %v5268_v11  ;;  %7095 = vst [vmem:[#allocation8_spill] sm:$0xff] %v5386_v57  ;;  %7096 = vst [vmem:[#allocation9_spill] sm:$0xff] %v5392_v59 }
   0xf   :  { %4523 = vmatprep.subr.mxu0 %v823_v6 }
  0x11   :  { %4446 = vmatmul.mubr.f32.vlgmr.msra.gmra.mrb[0].mxu0 %v5274_v13 }
  0x12   :  { %4524 = vmatpush3.xpose.msra.mxu0 %v823_v6  ;;  %4525 = vmatprep.mubr.f32.mxu0 %v5279_v14 }
  0x13   :  { %4603 = vmatprep.subr.mxu0 %v5253_v4 }
  0x19   :  { %4526 = vmatmul.mubr.f32.vlgmr.msra.gmra.mrb[0].mxu0 %v5302_v23 }
  0x1a   :  { %4528 = vmatprep.mubr.f32.mxu0 %v5310_v26  ;;  %4604 = vmatpush3.xpose.msra.mxu0 %v5253_v4 }
  0x1b   :  { %4683 = vmatprep.subr.mxu0 %v5261_v7 }
  0x1d   :  { %4529 = vmatmul.mubr.f32.gmra.mrb[2].mxu0 %v5321_v31 }
  0x1e   :  { %4531 = vmatprep.mubr.f32.mxu0 %v5330_v34 }
  0x21   :  { %4532 = vmatmul.mubr.f32.gmra.mrb[4].mxu0 %v5343_v39 }
  0x22   :  { %4534 = vmatprep.mubr.f32.mxu0 %v5352_v42 }
  0x25   :  { %4535 = vmatmul.mubr.f32.gmra.mrb[6].mxu0 %v5366_v48 }
  0x26   :  { %4537 = vmatprep.mubr.f32.mxu0 %v5375_v51 }
  0x27   :  { %10 = vsyncpa [#allocation3], 0  ;;  %v5401_v63 = vand.u32 4294901760, %v116_v55  ;;  %v39_v0 = vld [vmem:[%s6959_s1 + $0x88] sm:$0xff]  ;;  %v5408_v1 = vsub.f32 %v110_v53, %v5386_v57  ;;  %v5410_v2 = vand.u32 4294901760, %v119_v60  ;;  %v122_v3 = vsel %vm75_vm0, %v37_v61, 0 }
  0x28   :  { %v125_v6 = vsel %vm75_vm0, %v38_v62, 0  ;;  %v5416_v8 = vsub.f32 %v113_v54, %v5392_v59  ;;  %v6972_v9 = vand.u32 4294901760, %v5279_v14  ;;  %v6971_v10 = vand.u32 4294901760, %v5302_v23  ;;  %v40_v19 = vld [vmem:[%s6959_s1 + $0x90] sm:$0xff]  ;;  %v41_v36 = vld [vmem:[%s6959_s1 + $0x98] sm:$0xff]  ;;  %v42_v50 = vld [vmem:[%s6959_s1 + $0xa0] sm:$0xff] }
  0x29   :  { %7097 = vst [vmem:[#allocation10_spill] sm:$0xff] %v5401_v63  ;;  %4538 = vmatmul.mubr.f32.gmra.mrb[8].mxu0 %v5384_v56  ;;  %7098 = vst [vmem:[#allocation11_spill] sm:$0xff] %v5410_v2  ;;  %v6970_v12 = vand.u32 4294901760, %v5310_v26  ;;  %v5422_v15 = vsub.f32 %v116_v55, %v5401_v63  ;;  %v128_v16 = vsel %vm75_vm0, %v39_v0, 0  ;;  %v6969_v17 = vand.u32 4294901760, %v5321_v31 }
  0x2a   :  { %4540 = vmatprep.mubr.f32.mxu0 %v5390_v58  ;;  %v304_v20 = vsub.f32 %v5279_v14, %v6972_v9  ;;  %v314_v21 = vsub.f32 %v5302_v23, %v6971_v10  ;;  %v6968_v22 = vand.u32 4294901760, %v5330_v34  ;;  %v5441_v28 = vsub.f32 %v119_v60, %v5410_v2 }
  0x2b   :  { %v324_v25 = vsub.f32 %v5310_v26, %v6970_v12  ;;  %v5443_v29 = vand.u32 4294901760, %v122_v3  ;;  %v5445_v30 = vand.u32 4294901760, %v125_v6  ;;  %v334_v33 = vsub.f32 %v5321_v31, %v6969_v17 }
  0x2c   :  { %v305_v37 = vand.u32 4294901760, %v304_v20  ;;  %v315_v38 = vand.u32 4294901760, %v314_v21  ;;  %v344_v44 = vsub.f32 %v5330_v34, %v6968_v22  ;;  %v131_v45 = vsel %vm75_vm0, %v40_v19, 0  ;;  %v44_v19 = vld [vmem:[%s6959_s1 + $0xb0] sm:$0xff] }
  0x2d   :  { %4541 = vmatmul.mubr.f32.gmra.mrb[10].mxu0 %v5408_v1  ;;  %7099 = vst [vmem:[#allocation12_spill] sm:$0xff] %v5443_v29  ;;  %7100 = vst [vmem:[#allocation13_spill] sm:$0xff] %v5445_v30  ;;  %v325_v41 = vand.u32 4294901760, %v324_v25  ;;  %v6967_v46 = vand.u32 4294901760, %v5343_v39  ;;  %v5459_v47 = vand.u32 4294901760, %v128_v16  ;;  %v6964_v53 = vand.u32 4294901760, %v5352_v42 }
  0x2e   :  { %4543 = vmatprep.mubr.f32.mxu0 %v5416_v8  ;;  %4365 = vmatprep.mubr.f32.mxu1 %v305_v37  ;;  %v5467_v54 = vsub.f32 %v122_v3, %v5443_v29  ;;  %v134_v55 = vsel %vm75_vm0, %v41_v36, 0  ;;  %v335_v60 = vand.u32 4294901760, %v334_v33  ;;  %v5475_v62 = vsub.f32 %v125_v6, %v5445_v30  ;;  %v43_v3 = vld [vmem:[%s6959_s1 + $0xa8] sm:$0xff] }
  0x2f   :  { %7101 = vst [vmem:[#allocation14_spill] sm:$0xff] %v5459_v47  ;;  %4366 = vmatmul.mubr.f32.vlgmr.msra.gmra.mrb[0].mxu1 %v315_v38  ;;  %v354_v61 = vsub.f32 %v5343_v39, %v6967_v46  ;;  %v5477_v0 = vand.u32 4294901760, %v131_v45  ;;  %v345_v20 = vand.u32 4294901760, %v344_v44  ;;  %v364_v21 = vsub.f32 %v5352_v42, %v6964_v53 }
  0x30   :  { %4368 = vmatprep.mubr.f32.mxu1 %v325_v41  ;;  %v137_v25 = vsel %vm75_vm0, %v42_v50, 0  ;;  %v6966_v6 = vand.u32 4294901760, %v5366_v48  ;;  %4844 = vmatpush3.xpose.msra.mxu1 %v5268_v11  ;;  %v5492_v33 = vsub.f32 %v128_v16, %v5459_v47  ;;  %v5494_v36 = vand.u32 4294901760, %v134_v55 }
  0x31   :  { %4544 = vmatmul.mubr.f32.gmra.mrb[12].mxu0 %v5422_v15  ;;  %7102 = vst [vmem:[#allocation15_spill] sm:$0xff] %v5477_v0  ;;  %v6965_v37 = vand.u32 4294901760, %v5375_v51  ;;  %v140_v38 = vsel %vm75_vm0, %v43_v3, 0  ;;  %v143_v41 = vsel %vm75_vm0, %v44_v19, 0  ;;  %v355_v44 = vand.u32 4294901760, %v354_v61 }
  0x32   :  { %4546 = vmatprep.mubr.f32.mxu0 %v5441_v28  ;;  %7103 = vst [vmem:[#allocation16_spill] sm:$0xff] %v5494_v36  ;;  %v374_v50 = vsub.f32 %v5366_v48, %v6966_v6  ;;  %v5505_v11 = vsub.f32 %v131_v45, %v5477_v0  ;;  %v5507_v16 = vand.u32 4294901760, %v137_v25  ;;  %v365_v53 = vand.u32 4294901760, %v364_v21  ;;  %v46_v45 = vld [vmem:[%s6959_s1 + $0xc0] sm:$0xff]  ;;  %v47_v6 = vld [vmem:[%s6959_s1 + $0xc8] sm:$0xff] }
  0x33   :  { %4369 = vmatmul.mubr.f32.gmra.mrb[2].mxu1 %v335_v60  ;;  %v384_v3 = vsub.f32 %v5375_v51, %v6965_v37  ;;  %v45_v60 = vld [vmem:[%s6959_s1 + $0xb8] sm:$0xff]  ;;  %v6973_v61 = vand.u32 4294901760, %v5384_v56  ;;  %v5517_v19 = vsub.f32 %v134_v55, %v5494_v36  ;;  %v5524_v21 = vand.u32 4294901760, %v140_v38 }
  0x34   :  { %7104 = vst [vmem:[#allocation17_spill] sm:$0xff] %v5507_v16  ;;  %4371 = vmatprep.mubr.f32.mxu1 %v345_v20  ;;  %v6974_v20 = vand.u32 4294901760, %v5390_v58  ;;  %v5526_v37 = vand.u32 4294901760, %v143_v41  ;;  %v375_v46 = vand.u32 4294901760, %v374_v50  ;;  %v5536_v22 = vsub.f32 %v137_v25, %v5507_v16 }
  0x35   :  { %4547 = vmatmul.mubr.f32.gmra.mrb[14].mxu0 %v5467_v54  ;;  %7105 = vst [vmem:[#allocation18_spill] sm:$0xff] %v5524_v21  ;;  %v394_v55 = vsub.f32 %v5384_v56, %v6973_v61  ;;  %v146_v17 = vsel %vm75_vm0, %v45_v60, 0  ;;  %v385_v12 = vand.u32 4294901760, %v384_v3  ;;  %v6977_v50 = vand.u32 4294901760, %v5408_v1  ;;  %v48_v61 = vld [vmem:[%s6959_s1 + $0xd0] sm:$0xff] }
  0x36   :  { %4549 = vmatprep.mubr.f32.mxu0 %v5475_v62  ;;  %7106 = vst [vmem:[#allocation19_spill] sm:$0xff] %v5526_v37  ;;  %v404_v10 = vsub.f32 %v5390_v58, %v6974_v20  ;;  %v152_v9 = vsel %vm75_vm0, %v47_v6, 0  ;;  %v5553_v3 = vand.u32 4294901760, %v146_v17  ;;  %v5560_v6 = vsub.f32 %v143_v41, %v5526_v37  ;;  %v50_v41 = vld [vmem:[%s6959_s1 + $0xe0] sm:$0xff] }
  0x37   :  { %4372 = vmatmul.mubr.f32.gmra.mrb[4].mxu1 %v355_v44  ;;  %v149_v44 = vsel %vm75_vm0, %v46_v45, 0  ;;  %v395_v60 = vand.u32 4294901760, %v394_v55  ;;  %v414_v45 = vsub.f32 %v5408_v1, %v6977_v50  ;;  %v155_v13 = vsel %vm75_vm0, %v48_v61, 0 }
  0x38   :  { %4374 = vmatprep.mubr.f32.mxu1 %v365_v53  ;;  %v5551_v53 = vsub.f32 %v140_v38, %v5524_v21  ;;  %7108 = vst [vmem:[#allocation21_spill] sm:$0xff] %v5553_v3  ;;  %7109 = vst [vmem:[#allocation22_spill] sm:$0xff] %v5560_v6  ;;  %v5562_v20 = vand.u32 4294901760, %v149_v44  ;;  %v49_v38 = vld [vmem:[%s6959_s1 + $0xd8] sm:$0xff]  ;;  %v405_v25 = vand.u32 4294901760, %v404_v10  ;;  %v6986_v50 = vand.u32 4294901760, %v5422_v15 }
  0x39   :  { %4550 = vmatmul.mubr.f32.gmra.mrb[16].mxu0 %v5492_v33  ;;  %v5572_v5 = vand.u32 4294901760, %v152_v9  ;;  %v6995_v37 = vand.u32 4294901760, %v5441_v28  ;;  %v5580_v10 = vsub.f32 %v146_v17, %v5553_v3  ;;  %v5590_v16 = vand.u32 4294901760, %v155_v13  ;;  %v51_v17 = vld [vmem:[%s6959_s1 + $0xe8] sm:$0xff] }
  0x3a   :  { %4552 = vmatprep.mubr.f32.mxu0 %v5505_v11  ;;  %7107 = vst [vmem:[#allocation20_spill] sm:$0xff] %v5551_v53  ;;  %7110 = vst [vmem:[#allocation23_spill] sm:$0xff] %v5562_v20  ;;  %v434_v61 = vsub.f32 %v5422_v15, %v6986_v50  ;;  %v5588_v21 = vsub.f32 %v149_v44, %v5562_v20  ;;  %v161_v50 = vsel %vm75_vm0, %v50_v41, 0  ;;  %v6998_v44 = vand.u32 4294901760, %v5467_v54 }
  0x3b   :  { %4375 = vmatmul.mubr.f32.gmra.mrb[6].mxu1 %v375_v46  ;;  %v7111_v46 = vand.u32 4294901760, %v5416_v8  ;;  %7112 = vst [vmem:[#allocation24_spill] sm:$0xff] %v5572_v5  ;;  %7113 = vst [vmem:[#allocation25_spill] sm:$0xff] %v5580_v10  ;;  %v5604_v20 = vsub.f32 %v152_v9, %v5572_v5  ;;  %v5617_v9 = vsub.f32 %v155_v13, %v5590_v16  ;;  %v7120_v5 = vand.u32 4294901760, %v5475_v62  ;;  %v54_v13 = vld [vmem:[%s6959_s1 + $0x100] sm:$0xff] }
  0x3c   :  { %4377 = vmatprep.mubr.f32.mxu1 %v385_v12  ;;  %v158_v12 = vsel %vm75_vm0, %v49_v38, 0  ;;  %7114 = vst [vmem:[#allocation26_spill] sm:$0xff] %v5588_v21  ;;  %7115 = vst [vmem:[#allocation27_spill] sm:$0xff] %v5590_v16  ;;  %v444_v38 = vsub.f32 %v5441_v28, %v6995_v37  ;;  %v435_v0 = vand.u32 4294901760, %v434_v61  ;;  %v454_v41 = vsub.f32 %v5467_v54, %v6998_v44  ;;  %v55_v44 = vld [vmem:[%s6959_s1 + $0x108] sm:$0xff] }
  0x3d   :  { %4553 = vmatmul.mubr.f32.gmra.mrb[18].mxu0 %v5517_v19  ;;  %v424_v55 = vsub.f32 %v5416_v8, %v7111_v46  ;;  %v415_v46 = vand.u32 4294901760, %v414_v45  ;;  %7116 = vst [vmem:[#allocation28_spill] sm:$0xff] %v5604_v20  ;;  %v5606_v3 = vand.u32 4294901760, %v158_v12  ;;  %7118 = vst [vmem:[#allocation30_spill] sm:$0xff] %v5617_v9  ;;  %v5619_v37 = vand.u32 4294901760, %v161_v50 }
  0x3e   :  { %4555 = vmatprep.mubr.f32.mxu0 %v5536_v22  ;;  %v445_v36 = vand.u32 4294901760, %v444_v38  ;;  %v455_v61 = vand.u32 4294901760, %v454_v41  ;;  %v7126_v30 = vand.u32 4294901760, %v5505_v11  ;;  %v7013_v41 = vand.u32 4294901760, %v5517_v19 }
  0x3f   :  { %4378 = vmatmul.mubr.f32.gmra.mrb[8].mxu1 %v395_v60  ;;  %v52_v60 = vld [vmem:[%s6959_s1 + $0xf0] sm:$0xff]  ;;  %v425_v45 = vand.u32 4294901760, %v424_v55  ;;  %7117 = vst [vmem:[#allocation29_spill] sm:$0xff] %v5606_v3  ;;  %7119 = vst [vmem:[#allocation31_spill] sm:$0xff] %v5619_v37  ;;  %v176_v2 = vsel %vm75_vm0, %v55_v44, 0  ;;  %vm3459_vm1 = vcmask 261120  }
  0x40   :  { %4380 = vmatprep.mubr.f32.mxu1 %v405_v25  ;;  %v164_v25 = vsel %vm75_vm0, %v51_v17, 0  ;;  %v167_v55 = vsel %vm75_vm0, %v52_v60, 0  ;;  %v464_v17 = vsub.f32 %v5475_v62, %v7120_v5  ;;  %v5629_v60 = vsub.f32 %v158_v12, %v5606_v3 }
  0x41   :  { %4556 = vmatmul.mubr.f32.gmra.mrb[20].mxu0 %v5551_v53  ;;  %v5636_v38 = vand.u32 4294901760, %v164_v25  ;;  %v5638_v5 = vand.u32 4294901760, %v167_v55  ;;  %v7124_v12 = vand.u32 4294901760, %v5492_v33  ;;  %v484_v29 = vsub.f32 %v5505_v11, %v7126_v30 }
  0x42   :  { %4558 = vmatprep.mubr.f32.mxu0 %v5560_v6  ;;  %7121 = vst [vmem:[#allocation32_spill] sm:$0xff] %v5629_v60  ;;  %v465_v47 = vand.u32 4294901760, %v464_v17  ;;  %vm3824_vm2 = vcmask 654336   ;;  %vm3868_vm3 = vcmask 57344  }
  0x43   :  { %4381 = vmatmul.mubr.f32.gmra.mrb[10].mxu1 %v415_v46  ;;  %v53_v46 = vld [vmem:[%s6959_s1 + $0xf8] sm:$0xff]  ;;  %7122 = vst [vmem:[#allocation33_spill] sm:$0xff] %v5636_v38  ;;  %7123 = vst [vmem:[#allocation34_spill] sm:$0xff] %v5638_v5  ;;  %v474_v3 = vsub.f32 %v5492_v33, %v7124_v12  ;;  %v56_v12 = vld [vmem:[%s6959_s1 + $0x110] sm:$0xff]  ;;  %v5672_v44 = vsub.f32 %v167_v55, %v5638_v5  ;;  %v7030_v5 = vand.u32 4294901760, %v5560_v6 }
  0x44   :  { %4383 = vmatprep.mubr.f32.mxu1 %v425_v45  ;;  %v5648_v45 = vsub.f32 %v161_v50, %v5619_v37  ;;  %v170_v16 = vsel %vm75_vm0, %v53_v46, 0  ;;  %v494_v46 = vsub.f32 %v5517_v19, %v7013_v41  ;;  %v485_v50 = vand.u32 4294901760, %v484_v29  ;;  %v58_v55 = vld [vmem:[%s6959_s1 + $0x120] sm:$0xff] }
  0x45   :  { %4559 = vmatmul.mubr.f32.gmra.mrb[22].mxu0 %v5580_v10  ;;  %v5665_v17 = vand.u32 4294901760, %v170_v16  ;;  %v475_v30 = vand.u32 4294901760, %v474_v3  ;;  %7129 = vst [vmem:[#allocation38_spill] sm:$0xff] %v5672_v44  ;;  %v7022_v41 = vand.u32 4294901760, %v5551_v53  ;;  %v5684_v37 = vand.u32 4294901760, %v176_v2 }
  0x46   :  { %4561 = vmatprep.mubr.f32.mxu0 %v5588_v21  ;;  %7125 = vst [vmem:[#allocation35_spill] sm:$0xff] %v5648_v45 }
  0x47   :  { %4384 = vmatmul.mubr.f32.gmra.mrb[12].mxu1 %v435_v0  ;;  %v173_v0 = vsel %vm75_vm0, %v54_v13, 0  ;;  %7128 = vst [vmem:[#allocation37_spill] sm:$0xff] %v5665_v17  ;;  %7132 = vst [vmem:[#allocation40_spill] sm:$0xff] %v5684_v37  ;;  %v5692_v29 = vsub.f32 %v170_v16, %v5665_v17  ;;  %v59_v16 = vld [vmem:[%s6959_s1 + $0x128] sm:$0xff] }
  0x48   :  { %4386 = vmatprep.mubr.f32.mxu1 %v445_v36  ;;  %v5663_v36 = vsub.f32 %v164_v25, %v5636_v38  ;;  %v5674_v13 = vand.u32 4294901760, %v173_v0  ;;  %v57_v25 = vld [vmem:[%s6959_s1 + $0x118] sm:$0xff]  ;;  %v179_v38 = vsel %vm75_vm0, %v56_v12, 0  ;;  %v514_v12 = vsub.f32 %v5551_v53, %v7022_v41 }
  0x49   :  { %4562 = vmatmul.mubr.f32.gmra.mrb[24].mxu0 %v5604_v20  ;;  %7133 = vst [vmem:[#allocation41_spill] sm:$0xff] %v5692_v29  ;;  %v5702_v59 = vand.u32 4294901760, %v179_v38  ;;  %v185_v41 = vsel %vm75_vm0, %v58_v55, 0 }
  0x4a   :  { %4564 = vmatprep.mubr.f32.mxu0 %v5617_v9  ;;  %7127 = vst [vmem:[#allocation36_spill] sm:$0xff] %v5663_v36  ;;  %7130 = vst [vmem:[#allocation39_spill] sm:$0xff] %v5674_v13  ;;  %v5700_v63 = vsub.f32 %v173_v0, %v5674_v13  ;;  %v7033_v0 = vand.u32 4294901760, %v5580_v10  ;;  %v5716_v13 = vsub.f32 %v176_v2, %v5684_v37  ;;  %v515_v53 = vand.u32 4294901760, %v514_v12 }
  0x4b   :  { %4387 = vmatmul.mubr.f32.gmra.mrb[14].mxu1 %v455_v61  ;;  %v7131_v61 = vand.u32 4294901760, %v5536_v22  ;;  %7135 = vst [vmem:[#allocation43_spill] sm:$0xff] %v5702_v59  ;;  %v5729_v2 = vsub.f32 %v179_v38, %v5702_v59  ;;  %v7138_v37 = vand.u32 4294901760, %v5588_v21  ;;  %v62_v38 = vld [vmem:[%s6959_s1 + $0x140] sm:$0xff] }
  0x4c   :  { %4389 = vmatprep.mubr.f32.mxu1 %v465_v47  ;;  %v182_v47 = vsel %vm75_vm0, %v57_v25, 0  ;;  %7134 = vst [vmem:[#allocation42_spill] sm:$0xff] %v5700_v63  ;;  %v524_v25 = vsub.f32 %v5560_v6, %v7030_v5  ;;  %v534_v55 = vsub.f32 %v5580_v10, %v7033_v0  ;;  %v5731_v5 = vand.u32 4294901760, %v185_v41  ;;  %v63_v0 = vld [vmem:[%s6959_s1 + $0x148] sm:$0xff] }
  0x4d   :  { %4565 = vmatmul.mubr.f32.gmra.mrb[26].mxu0 %v5629_v60  ;;  %v504_v3 = vsub.f32 %v5536_v22, %v7131_v61  ;;  %v495_v61 = vand.u32 4294901760, %v494_v46  ;;  %v5718_v17 = vand.u32 4294901760, %v182_v47  ;;  %v7143_v10 = vand.u32 4294901760, %v5617_v9 }
  0x4e   :  { %4567 = vmatprep.mubr.f32.mxu0 %v5648_v45  ;;  %7137 = vst [vmem:[#allocation45_spill] sm:$0xff] %v5731_v5  ;;  %v525_v57 = vand.u32 4294901760, %v524_v25  ;;  %v535_v12 = vand.u32 4294901760, %v534_v55  ;;  %v7045_v55 = vand.u32 4294901760, %v5629_v60  ;;  %v200_v52 = vsel %vm75_vm0, %v63_v0, 0 }
  0x4f   :  { %4390 = vmatmul.mubr.f32.gmra.mrb[16].mxu1 %v475_v30  ;;  %v60_v30 = vld [vmem:[%s6959_s1 + $0x130] sm:$0xff]  ;;  %v505_v46 = vand.u32 4294901760, %v504_v3  ;;  %7136 = vst [vmem:[#allocation44_spill] sm:$0xff] %v5718_v17  ;;  %v564_v6 = vsub.f32 %v5617_v9, %v7143_v10 }
  0x50   :  { %4392 = vmatprep.mubr.f32.mxu1 %v485_v50  ;;  %v188_v50 = vsel %vm75_vm0, %v59_v16, 0  ;;  %v191_v3 = vsel %vm75_vm0, %v60_v30, 0  ;;  %v544_v16 = vsub.f32 %v5588_v21, %v7138_v37  ;;  %v5741_v30 = vsub.f32 %v182_v47, %v5718_v17 }
  0x51   :  { %4568 = vmatmul.mubr.f32.gmra.mrb[28].mxu0 %v5663_v36  ;;  %v5748_v25 = vand.u32 4294901760, %v188_v50  ;;  %v5750_v37 = vand.u32 4294901760, %v191_v3  ;;  %v7141_v47 = vand.u32 4294901760, %v5604_v20 }
  0x52   :  { %4570 = vmatprep.mubr.f32.mxu0 %v5672_v44  ;;  %v545_v21 = vand.u32 4294901760, %v544_v16 }
  0x53   :  { %4393 = vmatmul.mubr.f32.gmra.mrb[18].mxu1 %v495_v61  ;;  %v61_v61 = vld [vmem:[%s6959_s1 + $0x138] sm:$0xff]  ;;  %7139 = vst [vmem:[#allocation46_spill] sm:$0xff] %v5748_v25  ;;  %7140 = vst [vmem:[#allocation47_spill] sm:$0xff] %v5750_v37  ;;  %v554_v17 = vsub.f32 %v5604_v20, %v7141_v47  ;;  %v64_v47 = vld [vmem:[%s6959_s1 + $0x150] sm:$0xff]  ;;  %v5784_v0 = vsub.f32 %v191_v3, %v5750_v37  ;;  %v7059_v37 = vand.u32 4294901760, %v5672_v44 }
  0x54   :  { %4395 = vmatprep.mubr.f32.mxu1 %v505_v46  ;;  %v5760_v46 = vsub.f32 %v185_v41, %v5731_v5  ;;  %v194_v59 = vsel %vm75_vm0, %v61_v61, 0  ;;  %v574_v61 = vsub.f32 %v5629_v60, %v7045_v55  ;;  %v565_v41 = vand.u32 4294901760, %v564_v6  ;;  %v66_v3 = vld [vmem:[%s6959_s1 + $0x160] sm:$0xff] }
  0x55   :  { %4571 = vmatmul.mubr.f32.gmra.mrb[30].mxu0 %v5692_v29  ;;  %v5777_v16 = vand.u32 4294901760, %v194_v59  ;;  %v555_v10 = vand.u32 4294901760, %v554_v17  ;;  %v7052_v55 = vand.u32 4294901760, %v5663_v36  ;;  %v5796_v5 = vand.u32 4294901760, %v200_v52 }
  0x56   :  { %4573 = vmatprep.mubr.f32.mxu0 %v5700_v63  ;;  %7142 = vst [vmem:[#allocation48_spill] sm:$0xff] %v5760_v46 }
  0x57   :  { %4396 = vmatmul.mubr.f32.gmra.mrb[20].mxu1 %v515_v53  ;;  %v197_v53 = vsel %vm75_vm0, %v62_v38, 0  ;;  %7144 = vst [vmem:[#allocation49_spill] sm:$0xff] %v5777_v16  ;;  %7147 = vst [vmem:[#allocation51_spill] sm:$0xff] %v5796_v5 }
  0x58   :  { %4398 = vmatprep.mubr.f32.mxu1 %v525_v57  ;;  %v5775_v57 = vsub.f32 %v188_v50, %v5748_v25  ;;  %v5786_v38 = vand.u32 4294901760, %v197_v53  ;;  %v65_v50 = vld [vmem:[%s6959_s1 + $0x158] sm:$0xff]  ;;  %v203_v25 = vsel %vm75_vm0, %v64_v47, 0  ;;  %v594_v47 = vsub.f32 %v5663_v36, %v7052_v55 }
  0x59   :  { %4574 = vmatmul.mubr.f32.gmra.mrb[32].mxu0 %v5716_v13  ;;  %v206_v6 = vsel %vm75_vm0, %v65_v50, 0  ;;  %v5814_v60 = vand.u32 4294901760, %v203_v25  ;;  %v604_v50 = vsub.f32 %v5672_v44, %v7059_v37  ;;  %v209_v55 = vsel %vm75_vm0, %v66_v3, 0 }
  0x5a   :  { %4576 = vmatprep.mubr.f32.mxu0 %v5729_v2  ;;  %7145 = vst [vmem:[#allocation50_spill] sm:$0xff] %v5786_v38  ;;  %v595_v9 = vand.u32 4294901760, %v594_v47  ;;  %v5843_v37 = vand.u32 4294901760, %v209_v55 }
  0x5b   :  { %4399 = vmatmul.mubr.f32.gmra.mrb[22].mxu1 %v535_v12  ;;  %v7146_v12 = vand.u32 4294901760, %v5648_v45  ;;  %7148 = vst [vmem:[#allocation52_spill] sm:$0xff] %v5814_v60  ;;  %v605_v36 = vand.u32 4294901760, %v604_v50 }
  0x5c   :  { %4401 = vmatprep.mubr.f32.mxu1 %v545_v21  ;;  %v5804_v21 = vsub.f32 %v194_v59, %v5777_v16  ;;  %v67_v59 = vld [vmem:[%s6959_s1 + $0x168] sm:$0xff]  ;;  %v5830_v16 = vand.u32 4294901760, %v206_v6  ;;  %7150 = vst [vmem:[#allocation54_spill] sm:$0xff] %v5843_v37 }
  0x5d   :  { %4577 = vmatmul.mubr.f32.gmra.mrb[34].mxu0 %v5741_v30  ;;  %v584_v17 = vsub.f32 %v5648_v45, %v7146_v12  ;;  %v575_v12 = vand.u32 4294901760, %v574_v61  ;;  %v5812_v45 = vsub.f32 %v197_v53, %v5786_v38  ;;  %v7062_v53 = vand.u32 4294901760, %v5692_v29 }
  0x5e   :  { %4579 = vmatprep.mubr.f32.mxu0 %v5760_v46  ;;  %v5828_v38 = vsub.f32 %v200_v52, %v5796_v5  ;;  %7149 = vst [vmem:[#allocation53_spill] sm:$0xff] %v5830_v16  ;;  %v5841_v52 = vsub.f32 %v203_v25, %v5814_v60  ;;  %v7151_v5 = vand.u32 4294901760, %v5700_v63  ;;  %v70_v25 = vld [vmem:[%s6959_s1 + $0x180] sm:$0xff] }
  0x5f   :  { %4402 = vmatmul.mubr.f32.gmra.mrb[24].mxu1 %v555_v10  ;;  %v68_v10 = vld [vmem:[%s6959_s1 + $0x170] sm:$0xff]  ;;  %v585_v61 = vand.u32 4294901760, %v584_v17  ;;  %v614_v3 = vsub.f32 %v5692_v29, %v7062_v53  ;;  %v71_v53 = vld [vmem:[%s6959_s1 + $0x188] sm:$0xff]  ;;  %v7155_v29 = vand.u32 4294901760, %v5729_v2 }
  0x60   :  { %4404 = vmatprep.mubr.f32.mxu1 %v565_v41  ;;  %v212_v41 = vsel %vm75_vm0, %v67_v59, 0  ;;  %v215_v17 = vsel %vm75_vm0, %v68_v10, 0  ;;  %v624_v59 = vsub.f32 %v5700_v63, %v7151_v5  ;;  %v5853_v10 = vsub.f32 %v206_v6, %v5830_v16 }
  0x61   :  { %4580 = vmatmul.mubr.f32.gmra.mrb[36].mxu0 %v5775_v57  ;;  %v5860_v50 = vand.u32 4294901760, %v212_v41  ;;  %v5862_v5 = vand.u32 4294901760, %v215_v17  ;;  %v615_v47 = vand.u32 4294901760, %v614_v3  ;;  %v7154_v6 = vand.u32 4294901760, %v5716_v13 }
  0x62   :  { %4582 = vmatprep.mubr.f32.mxu0 %v5784_v0  ;;  %v625_v63 = vand.u32 4294901760, %v624_v59  ;;  %v644_v44 = vsub.f32 %v5729_v2, %v7155_v29  ;;  %v7073_v3 = vand.u32 4294901760, %v5741_v30  ;;  %v224_v20 = vsel %vm75_vm0, %v71_v53, 0 }
  0x63   :  { %4405 = vmatmul.mubr.f32.gmra.mrb[26].mxu1 %v575_v12  ;;  %v69_v12 = vld [vmem:[%s6959_s1 + $0x178] sm:$0xff]  ;;  %7152 = vst [vmem:[#allocation55_spill] sm:$0xff] %v5860_v50  ;;  %7153 = vst [vmem:[#allocation56_spill] sm:$0xff] %v5862_v5  ;;  %v634_v16 = vsub.f32 %v5716_v13, %v7154_v6  ;;  %v72_v6 = vld [vmem:[%s6959_s1 + $0x190] sm:$0xff]  ;;  %v5896_v53 = vsub.f32 %v215_v17, %v5862_v5 }
  0x64   :  { %4407 = vmatprep.mubr.f32.mxu1 %v585_v61  ;;  %v5872_v61 = vsub.f32 %v209_v55, %v5843_v37  ;;  %v218_v60 = vsel %vm75_vm0, %v69_v12, 0  ;;  %v654_v12 = vsub.f32 %v5741_v30, %v7073_v3  ;;  %v645_v55 = vand.u32 4294901760, %v644_v44 }
  0x65   :  { %4583 = vmatmul.mubr.f32.gmra.mrb[38].mxu0 %v5804_v21  ;;  %v5889_v59 = vand.u32 4294901760, %v218_v60  ;;  %v635_v29 = vand.u32 4294901760, %v634_v16  ;;  %v7081_v3 = vand.u32 4294901760, %v5775_v57  ;;  %v5908_v37 = vand.u32 4294901760, %v224_v20 }
  0x66   :  { %4585 = vmatprep.mubr.f32.mxu0 %v5812_v45  ;;  %v655_v44 = vand.u32 4294901760, %v654_v12  ;;  %v7085_v12 = vand.u32 4294901760, %v5812_v45 }
  0x67   :  { %4408 = vmatmul.mubr.f32.gmra.mrb[28].mxu1 %v595_v9  ;;  %v221_v9 = vsel %vm75_vm0, %v70_v25, 0  ;;  %7156 = vst [vmem:[#allocation57_spill] sm:$0xff] %v5889_v59  ;;  %7158 = vst [vmem:[#allocation58_spill] sm:$0xff] %v5908_v37  ;;  %v5913_v5 = vsub.f32 %v218_v60, %v5889_v59  ;;  %v7159_v60 = vand.u32 4294901760, %v5784_v0 }
  0x68   :  { %4410 = vmatprep.mubr.f32.mxu1 %v605_v36  ;;  %v5887_v36 = vsub.f32 %v212_v41, %v5860_v50  ;;  %v5898_v25 = vand.u32 4294901760, %v221_v9  ;;  %v73_v41 = vld [vmem:[%s6959_s1 + $0x198] sm:$0xff]  ;;  %v227_v50 = vsel %vm75_vm0, %v72_v6, 0 }
  0x69   :  { %4586 = vmatmul.mubr.f32.gmra.mrb[40].mxu0 %v5828_v38  ;;  %v684_v59 = vsub.f32 %v5784_v0, %v7159_v60 }
  0x6a   :  { %4588 = vmatprep.mubr.f32.mxu0 %v5841_v52  ;;  %v5921_v6 = vsub.f32 %v221_v9, %v5898_v25 }
  0x6b   :  { %4411 = vmatmul.mubr.f32.gmra.mrb[30].mxu1 %v615_v47  ;;  %v7157_v47 = vand.u32 4294901760, %v5760_v46  ;;  %v685_v60 = vand.u32 4294901760, %v684_v59 }
  0x6c   :  { %4413 = vmatprep.mubr.f32.mxu1 %v625_v63  ;;  %v230_v63 = vsel %vm75_vm0, %v73_v41, 0  ;;  %v5932_v41 = vsub.f32 %v224_v20, %v5908_v37  ;;  %v704_v20 = vsub.f32 %v5812_v45, %v7085_v12  ;;  %v7086_v37 = vand.u32 4294901760, %v5828_v38 }
  0x6d   :  { %4589 = vmatmul.mubr.f32.gmra.mrb[42].mxu0 %v5853_v10  ;;  %v664_v16 = vsub.f32 %v5760_v46, %v7157_v47  ;;  %v674_v47 = vsub.f32 %v5775_v57, %v7081_v3  ;;  %v5923_v46 = vand.u32 4294901760, %v227_v50  ;;  %v5934_v3 = vand.u32 4294901760, %v230_v63 }
  0x6e   :  { %4591 = vmatprep.mubr.f32.mxu0 %v5872_v61  ;;  %v705_v59 = vand.u32 4294901760, %v704_v20  ;;  %v753_v20 = vand.u32 4294901760, %v5887_v36 }
  0x6f   :  { %4414 = vmatmul.mubr.f32.gmra.mrb[32].mxu1 %v635_v29  ;;  %v665_v17 = vand.u32 4294901760, %v664_v16  ;;  %v7084_v29 = vand.u32 4294901760, %v5804_v21  ;;  %7160 = vst [vmem:[#allocation59_spill] sm:$0xff] %v5934_v3  ;;  %v675_v9 = vand.u32 4294901760, %v674_v47  ;;  %v5941_v16 = vsub.f32 %v227_v50, %v5923_v46 }
  0x70   :  { %4416 = vmatprep.mubr.f32.mxu1 %v645_v55  ;;  %v714_v50 = vsub.f32 %v5828_v38, %v7086_v37  ;;  %v7161_v37 = vand.u32 4294901760, %v5279_v14  ;;  %v754_v14 = vsub.f32 %v5887_v36, %v753_v20 }
  0x71   :  { %4592 = vmatmul.mubr.f32.gmra.mrb[44].mxu0 %v5887_v36  ;;  %v694_v55 = vsub.f32 %v5804_v21, %v7084_v29  ;;  %v7087_v29 = vand.u32 4294901760, %v5841_v52  ;;  %v7246_v36 = vld [vmem:[#allocation49_spill] sm:$0xff] }
  0x72   :  { %4594 = vmatprep.mubr.f32.mxu0 %v5896_v53 }
  0x73   :  { %4417 = vmatmul.mubr.f32.gmra.mrb[34].mxu1 %v655_v44  ;;  %v5949_v44 = vsub.f32 %v230_v63, %v5934_v3  ;;  %v695_v47 = vand.u32 4294901760, %v694_v55  ;;  %v724_v12 = vsub.f32 %v5841_v52, %v7087_v29  ;;  %v743_v63 = vand.u32 4294901760, %v5872_v61 }
  0x74   :  { %4419 = vmatprep.mubr.f32.mxu1 %v665_v17  ;;  %v733_v17 = vand.u32 4294901760, %v5853_v10  ;;  %v763_v3 = vand.u32 4294901760, %v5896_v53 }
  0x75   :  { %4595 = vmatmul.mubr.f32.gmra.mrb[46].mxu0 %v5913_v5  ;;  %v725_v29 = vand.u32 4294901760, %v724_v12 }
  0x76   :  { %4597 = vmatprep.mubr.f32.mxu0 %v5921_v6  ;;  %v734_v55 = vsub.f32 %v5853_v10, %v733_v17  ;;  %v764_v12 = vsub.f32 %v5896_v53, %v763_v3  ;;  %v7244_v10 = vld [vmem:[#allocation46_spill] sm:$0xff]  ;;  %v7249_v53 = vld [vmem:[#allocation5_spill] sm:$0xff] }
  0x77   :  { %4420 = vmatmul.mubr.f32.gmra.mrb[36].mxu1 %v675_v9  ;;  %v715_v9 = vand.u32 4294901760, %v714_v50 }
  0x78   :  { %4422 = vmatprep.mubr.f32.mxu1 %v685_v60  ;;  %v744_v60 = vsub.f32 %v5872_v61, %v743_v63  ;;  %v735_v50 = vand.u32 4294901760, %v734_v55  ;;  %v7164_v55 = vand.u32 4294901760, %v5321_v31  ;;  %v803_v31 = vand.u32 4294901760, %v5941_v16  ;;  %v7245_v61 = vld [vmem:[#allocation47_spill] sm:$0xff] }
  0x79   :  { %4598 = vmatmul.mubr.f32.gmra.mrb[48].mxu0 %v5932_v41 }
  0x7a   :  { %4600 = vmatprep.mubr.f32.mxu0 %v5941_v16 }
  0x7b   :  { %4423 = vmatmul.mubr.f32.gmra.mrb[38].mxu1 %v695_v47  ;;  %v7162_v47 = vand.u32 4294901760, %v5302_v23  ;;  %v773_v23 = vand.u32 4294901760, %v5913_v5 }
  0x7c   :  { %4425 = vmatprep.mubr.f32.mxu1 %v705_v59  ;;  %v745_v59 = vand.u32 4294901760, %v744_v60  ;;  %v7165_v60 = vand.u32 4294901760, %v5330_v34 }
  0x7d   :  { %4601 = vmatmul.mubr.f32.gmra.mrb[50].mxu0 %v5949_v44 }
  0x7e   :  { %4605 = vmatprep.mubr.f32.mxu0 %v7161_v37  ;;  %v7163_v37 = vand.u32 4294901760, %v5310_v26  ;;  %v755_v26 = vand.u32 4294901760, %v754_v14 }
  0x7f   :  { %4426 = vmatmul.mubr.f32.gmra.mrb[40].mxu1 %v715_v9  ;;  %v783_v9 = vand.u32 4294901760, %v5921_v6 }
  0x80   :  { %4428 = vmatprep.mubr.f32.mxu1 %v725_v29  ;;  %v765_v29 = vand.u32 4294901760, %v764_v12 }
  0x81   :  { %4606 = vmatmul.mubr.f32.vlgmr.msra.gmra.mrb[0].mxu0 %v7162_v47  ;;  %v784_v47 = vsub.f32 %v5921_v6, %v783_v9  ;;  %v7250_v6 = vld [vmem:[#allocation52_spill] sm:$0xff] }
  0x82   :  { %4608 = vmatprep.mubr.f32.mxu0 %v7163_v37  ;;  %4684 = vmatpush3.xpose.msra.mxu0 %v5261_v7  ;;  %v774_v7 = vsub.f32 %v5913_v5, %v773_v23  ;;  %v793_v37 = vand.u32 4294901760, %v5932_v41  ;;  %v7248_v5 = vld [vmem:[#allocation51_spill] sm:$0xff] }
  0x83   :  { %4763 = vmatprep.subr.mxu0 %v5253_v4  ;;  %4429 = vmatmul.mubr.f32.gmra.mrb[42].mxu1 %v735_v50  ;;  %v7166_v50 = vand.u32 4294901760, %v5343_v39  ;;  %v785_v12 = vand.u32 4294901760, %v784_v47  ;;  %v7168_v39 = vand.u32 4294901760, %v5366_v48  ;;  %v7170_v47 = vand.u32 4294901760, %v5384_v56 }
  0x84   :  { %4431 = vmatprep.mubr.f32.mxu1 %v745_v59  ;;  %v775_v14 = vand.u32 4294901760, %v774_v7  ;;  %v794_v34 = vsub.f32 %v5932_v41, %v793_v37  ;;  %v7167_v59 = vand.u32 4294901760, %v5352_v42  ;;  %v7169_v42 = vand.u32 4294901760, %v5375_v51  ;;  %v7252_v41 = vld [vmem:[#allocation53_spill] sm:$0xff] }
  0x85   :  { %4609 = vmatmul.mubr.f32.gmra.mrb[2].mxu0 %v7164_v55  ;;  %v804_v55 = vsub.f32 %v5941_v16, %v803_v31  ;;  %v7172_v48 = vand.u32 4294901760, %v5408_v1  ;;  %v7174_v51 = vand.u32 4294901760, %v5422_v15  ;;  %v7175_v56 = vand.u32 4294901760, %v5441_v28  ;;  %v7253_v16 = vld [vmem:[#allocation54_spill] sm:$0xff] }
  0x86   :  { %4611 = vmatprep.mubr.f32.mxu0 %v7165_v60  ;;  %v813_v60 = vand.u32 4294901760, %v5949_v44  ;;  %v7177_v1 = vand.u32 4294901760, %v5475_v62  ;;  %v7179_v15 = vand.u32 4294901760, %v5505_v11  ;;  %v7180_v28 = vand.u32 4294901760, %v5517_v19  ;;  %v7182_v62 = vld [vmem:[#allocation7_spill] sm:$0xff] }
  0x87   :  { %4432 = vmatmul.mubr.f32.gmra.mrb[44].mxu1 %v755_v26  ;;  %v795_v26 = vand.u32 4294901760, %v794_v34  ;;  %v7183_v34 = vld [vmem:[#allocation20_spill] sm:$0xff] }
  0x88   :  { %4434 = vmatprep.mubr.f32.mxu1 %v765_v29  ;;  %v814_v7 = vsub.f32 %v5949_v44, %v813_v60  ;;  %v805_v29 = vand.u32 4294901760, %v804_v55  ;;  %v7186_v55 = vld [vmem:[#allocation22_spill] sm:$0xff]  ;;  %v7254_v44 = vld [vmem:[#allocation55_spill] sm:$0xff] }
  0x89   :  { %4612 = vmatmul.mubr.f32.gmra.mrb[4].mxu0 %v7166_v50  ;;  %v7187_v11 = vand.u32 4294901760, %v7186_v55  ;;  %v7210_v55 = vld [vmem:[#allocation38_spill] sm:$0xff] }
  0x8a   :  { %4614 = vmatprep.mubr.f32.mxu0 %v7167_v59  ;;  %v815_v50 = vand.u32 4294901760, %v814_v7  ;;  %v7171_v59 = vand.u32 4294901760, %v5390_v58  ;;  %v7176_v58 = vand.u32 4294901760, %v5467_v54  ;;  %v7181_v54 = vand.u32 4294901760, %v5536_v22  ;;  %v7191_v7 = vld [vmem:[#allocation10_spill] sm:$0xff] }
  0x8b   :  { %4435 = vmatmul.mubr.f32.gmra.mrb[46].mxu1 %v775_v14  ;;  %v7173_v14 = vand.u32 4294901760, %v5416_v8  ;;  %v7178_v8 = vand.u32 4294901760, %v5492_v33  ;;  %v7184_v33 = vand.u32 4294901760, %v7183_v34 }
  0x8c   :  { %4437 = vmatprep.mubr.f32.mxu1 %v785_v12  ;;  %v7185_v12 = vld [vmem:[#allocation8_spill] sm:$0xff] }
  0x8d   :  { %4615 = vmatmul.mubr.f32.gmra.mrb[6].mxu0 %v7168_v39  ;;  %v7188_v39 = vld [vmem:[#allocation9_spill] sm:$0xff] }
  0x8e   :  { %4617 = vmatprep.mubr.f32.mxu0 %v7169_v42  ;;  %v7192_v42 = vld [vmem:[#allocation26_spill] sm:$0xff] }
  0x8f   :  { %4438 = vmatmul.mubr.f32.gmra.mrb[48].mxu1 %v795_v26  ;;  %v7189_v26 = vld [vmem:[#allocation25_spill] sm:$0xff]  ;;  %v7193_v22 = vand.u32 4294901760, %v7192_v42 }
  0x90   :  { %4440 = vmatprep.mubr.f32.mxu1 %v805_v29  ;;  %v7190_v19 = vand.u32 4294901760, %v7189_v26  ;;  %v7194_v29 = vld [vmem:[#allocation11_spill] sm:$0xff]  ;;  %v7212_v26 = vld [vmem:[#allocation17_spill] sm:$0xff] }
  0x91   :  { %4618 = vmatmul.mubr.f32.gmra.mrb[8].mxu0 %v7170_v47  ;;  %v7195_v47 = vld [vmem:[#allocation28_spill] sm:$0xff] }
  0x92   :  { %4620 = vmatprep.mubr.f32.mxu0 %v7171_v59  ;;  %v7197_v59 = vld [vmem:[#allocation12_spill] sm:$0xff] }
  0x93   :  { %4441 = vmatmul.mubr.f32.gmra.mrb[50].mxu1 %v815_v50  ;;  %v7196_v50 = vand.u32 4294901760, %v7195_v47  ;;  %v7216_v47 = vld [vmem:[#allocation42_spill] sm:$0xff] }
  0x94   :  { %4448 = vmatprep.mubr.f32.mxu1 %v5290_v18 }
  0x95   :  { %4621 = vmatmul.mubr.f32.gmra.mrb[10].mxu0 %v7172_v48  ;;  %v7198_v48 = vld [vmem:[#allocation30_spill] sm:$0xff] }
  0x96   :  { %4623 = vmatprep.mubr.f32.mxu0 %v7173_v14  ;;  %v7199_v14 = vand.u32 4294901760, %v7198_v48  ;;  %v7218_v48 = vld [vmem:[#allocation19_spill] sm:$0xff] }
  0x97   :  { %4449 = vmatmul.mubr.f32.vlgmr.msra.gmra.mrb[2].mxu1 %v5304_v24 }
  0x98   :  { %4451 = vmatprep.mubr.f32.mxu1 %v5312_v27 }
  0x99   :  { %4624 = vmatmul.mubr.f32.gmra.mrb[12].mxu0 %v7174_v51  ;;  %v7200_v51 = vld [vmem:[#allocation13_spill] sm:$0xff] }
  0x9a   :  { %4626 = vmatprep.mubr.f32.mxu0 %v7175_v56  ;;  %v7201_v56 = vld [vmem:[#allocation32_spill] sm:$0xff] }
  0x9b   :  { %4452 = vmatmul.mubr.f32.gmra.mrb[4].mxu1 %v5323_v32 }
  0x9c   :  { %4454 = vmatprep.mubr.f32.mxu1 %v5332_v35 }
  0x9d   :  { %4627 = vmatmul.mubr.f32.gmra.mrb[14].mxu0 %v7176_v58  ;;  %v7202_v58 = vand.u32 4294901760, %v7201_v56  ;;  %v7220_v56 = vld [vmem:[#allocation21_spill] sm:$0xff] }
  0x9e   :  { %4629 = vmatprep.mubr.f32.mxu0 %v7177_v1  ;;  %v7203_v1 = vld [vmem:[#allocation14_spill] sm:$0xff] }
  0x9f   :  { %4455 = vmatmul.mubr.f32.gmra.mrb[6].mxu1 %v5345_v40 }
  0xa0   :  { %4457 = vmatprep.mubr.f32.mxu1 %v5354_v43 }
  0xa1   :  { %4630 = vmatmul.mubr.f32.gmra.mrb[16].mxu0 %v7178_v8  ;;  %v7204_v8 = vld [vmem:[#allocation35_spill] sm:$0xff] }
  0xa2   :  { %4632 = vmatprep.mubr.f32.mxu0 %v7179_v15  ;;  %v7205_v15 = vand.u32 4294901760, %v7204_v8  ;;  %v7222_v8 = vld [vmem:[#allocation23_spill] sm:$0xff] }
  0xa3   :  { %4458 = vmatmul.mubr.f32.gmra.mrb[8].mxu1 %v5368_v49 }
  0xa4   :  { %4460 = vmatprep.mubr.f32.mxu1 %v7182_v62 }
  0xa5   :  { %4633 = vmatmul.mubr.f32.gmra.mrb[18].mxu0 %v7180_v28  ;;  %v7206_v28 = vld [vmem:[#allocation15_spill] sm:$0xff] }
  0xa6   :  { %4635 = vmatprep.mubr.f32.mxu0 %v7181_v54  ;;  %v7207_v54 = vld [vmem:[#allocation36_spill] sm:$0xff] }
  0xa7   :  { %4461 = vmatmul.mubr.f32.gmra.mrb[10].mxu1 %v7185_v12  ;;  %v7208_v34 = vand.u32 4294901760, %v7207_v54  ;;  %v7224_v54 = vld [vmem:[#allocation24_spill] sm:$0xff] }
  0xa8   :  { %4463 = vmatprep.mubr.f32.mxu1 %v7188_v39 }
  0xa9   :  { %4636 = vmatmul.mubr.f32.gmra.mrb[20].mxu0 %v7184_v33  ;;  %v7209_v33 = vld [vmem:[#allocation16_spill] sm:$0xff] }
  0xaa   :  { %4638 = vmatprep.mubr.f32.mxu0 %v7187_v11  ;;  %v7211_v11 = vand.u32 4294901760, %v7210_v55 }
  0xab   :  { %4464 = vmatmul.mubr.f32.gmra.mrb[12].mxu1 %v7191_v7 }
  0xac   :  { %4466 = vmatprep.mubr.f32.mxu1 %v7194_v29 }
  0xad   :  { %4639 = vmatmul.mubr.f32.gmra.mrb[22].mxu0 %v7190_v19  ;;  %v7213_v19 = vld [vmem:[#allocation41_spill] sm:$0xff] }
  0xae   :  { %4641 = vmatprep.mubr.f32.mxu0 %v7193_v22  ;;  %v7214_v42 = vand.u32 4294901760, %v7213_v19  ;;  %v7215_v22 = vld [vmem:[#allocation18_spill] sm:$0xff]  ;;  %v7229_v19 = vld [vmem:[#allocation29_spill] sm:$0xff] }
  0xaf   :  { %4467 = vmatmul.mubr.f32.gmra.mrb[14].mxu1 %v7197_v59 }
  0xb0   :  { %4469 = vmatprep.mubr.f32.mxu1 %v7200_v51 }
  0xb1   :  { %4642 = vmatmul.mubr.f32.gmra.mrb[24].mxu0 %v7196_v50  ;;  %v7217_v50 = vand.u32 4294901760, %v7216_v47  ;;  %v7233_v47 = vld [vmem:[#allocation33_spill] sm:$0xff] }
  0xb2   :  { %4644 = vmatprep.mubr.f32.mxu0 %v7199_v14  ;;  %v7219_v14 = vand.u32 4294901760, %v5716_v13  ;;  %v7228_v13 = vand.u32 4294901760, %v5775_v57  ;;  %v7236_v57 = vand.u32 4294901760, %v5828_v38  ;;  %v7242_v38 = vld [vmem:[#allocation44_spill] sm:$0xff] }
  0xb3   :  { %4470 = vmatmul.mubr.f32.gmra.mrb[16].mxu1 %v7203_v1 }
  0xb4   :  { %4472 = vmatprep.mubr.f32.mxu1 %v7206_v28 }
  0xb5   :  { %4645 = vmatmul.mubr.f32.gmra.mrb[26].mxu0 %v7202_v58  ;;  %v7221_v58 = vand.u32 4294901760, %v5729_v2  ;;  %v7230_v2 = vand.u32 4294901760, %v5784_v0  ;;  %v7238_v0 = vand.u32 4294901760, %v5841_v52  ;;  %v7243_v52 = vld [vmem:[#allocation45_spill] sm:$0xff] }
  0xb6   :  { %4647 = vmatprep.mubr.f32.mxu0 %v7205_v15  ;;  %v7223_v15 = vand.u32 4294901760, %v5741_v30  ;;  %v7232_v30 = vand.u32 4294901760, %v5804_v21  ;;  %v7240_v21 = vld [vmem:[#allocation40_spill] sm:$0xff] }
  0xb7   :  { %4473 = vmatmul.mubr.f32.gmra.mrb[18].mxu1 %v7209_v33 }
  0xb8   :  { %4475 = vmatprep.mubr.f32.mxu1 %v7212_v26 }
  0xb9   :  { %4648 = vmatmul.mubr.f32.gmra.mrb[28].mxu0 %v7208_v34  ;;  %v7225_v34 = vld [vmem:[#allocation48_spill] sm:$0xff] }
  0xba   :  { %4650 = vmatprep.mubr.f32.mxu0 %v7211_v11  ;;  %v7226_v55 = vand.u32 4294901760, %v7225_v34  ;;  %v7227_v11 = vld [vmem:[#allocation27_spill] sm:$0xff]  ;;  %v2900_v34 = vld [vmem:[%s6960_s2] sm:$0xff] }
  0xbb   :  { %4476 = vmatmul.mubr.f32.gmra.mrb[20].mxu1 %v7215_v22 }
  0xbc   :  { %4478 = vmatprep.mubr.f32.mxu1 %v7218_v48 }
  0xbd   :  { %4651 = vmatmul.mubr.f32.gmra.mrb[30].mxu0 %v7214_v42  ;;  %v7231_v42 = vld [vmem:[#allocation31_spill] sm:$0xff] }
  0xbe   :  { %4653 = vmatprep.mubr.f32.mxu0 %v7217_v50  ;;  %v7234_v50 = vand.u32 4294901760, %v5812_v45  ;;  %v7241_v45 = vld [vmem:[#allocation43_spill] sm:$0xff] }
  0xbf   :  { %4479 = vmatmul.mubr.f32.gmra.mrb[22].mxu1 %v7220_v56 }
  0xc0   :  { %4481 = vmatprep.mubr.f32.mxu1 %v7222_v8 }
  0xc1   :  { %4654 = vmatmul.mubr.f32.gmra.mrb[32].mxu0 %v7219_v14  ;;  %v7235_v14 = vld [vmem:[#allocation34_spill] sm:$0xff] }
  0xc2   :  { %4656 = vmatprep.mubr.f32.mxu0 %v7221_v58  ;;  %v7237_v58 = vld [vmem:[#allocation37_spill] sm:$0xff] }
  0xc3   :  { %4482 = vmatmul.mubr.f32.gmra.mrb[24].mxu1 %v7224_v54 }
  0xc4   :  { %4484 = vmatprep.mubr.f32.mxu1 %v7227_v11 }
  0xc5   :  { %4657 = vmatmul.mubr.f32.gmra.mrb[34].mxu0 %v7223_v15  ;;  %v7239_v15 = vld [vmem:[#allocation39_spill] sm:$0xff] }
  0xc6   :  { %4659 = vmatprep.mubr.f32.mxu0 %v7226_v55  ;;  %v2901_v55 = vld [vmem:[%s6960_s2 + $0x8] sm:$0xff] }
  0xc7   :  { %4485 = vmatmul.mubr.f32.gmra.mrb[26].mxu1 %v7229_v19 }
  0xc8   :  { %4487 = vmatprep.mubr.f32.mxu1 %v7231_v42 }
  0xc9   :  { %4660 = vmatmul.mubr.f32.gmra.mrb[36].mxu0 %v7228_v13  ;;  %v2918_v13 = vld [vmem:[%s6960_s2 + $0x90] sm:$0xff] }
  0xca   :  { %4662 = vmatprep.mubr.f32.mxu0 %v7230_v2  ;;  %v2952_v2 = vpack.c.bf16 %v2901_v55, %v2900_v34  ;;  %v2922_v55 = vld [vmem:[%s6960_s2 + $0xb0] sm:$0xff] }
  0xcb   :  { %4488 = vmatmul.mubr.f32.gmra.mrb[28].mxu1 %v7233_v47 }
  0xcc   :  { %4490 = vmatprep.mubr.f32.mxu1 %v7235_v14 }
  0xcd   :  { %4663 = vmatmul.mubr.f32.gmra.mrb[38].mxu0 %v7232_v30  ;;  %v2919_v30 = vld [vmem:[%s6960_s2 + $0x98] sm:$0xff] }
  0xce   :  { %4665 = vmatprep.mubr.f32.mxu0 %v7234_v50  ;;  %v2961_v50 = vpack.c.bf16 %v2919_v30, %v2918_v13  ;;  %v2923_v13 = vld [vmem:[%s6960_s2 + $0xb8] sm:$0xff] }
  0xcf   :  { %4491 = vmatmul.mubr.f32.gmra.mrb[30].mxu1 %v7237_v58  ;;  %v2963_v30 = vpack.c.bf16 %v2923_v13, %v2922_v55  ;;  %v2926_v13 = vld [vmem:[%s6960_s2 + $0xd0] sm:$0xff] }
  0xd0   :  { %4493 = vmatprep.mubr.f32.mxu1 %v7239_v15 }
  0xd1   :  { %4666 = vmatmul.mubr.f32.gmra.mrb[40].mxu0 %v7236_v57  ;;  %v2920_v57 = vld [vmem:[%s6960_s2 + $0xa0] sm:$0xff] }
  0xd2   :  { %4668 = vmatprep.mubr.f32.mxu0 %v7238_v0  ;;  %v2921_v0 = vld [vmem:[%s6960_s2 + $0xa8] sm:$0xff] }
  0xd3   :  { %4494 = vmatmul.mubr.f32.gmra.mrb[32].mxu1 %v7240_v21 }
  0xd4   :  { %4496 = vmatprep.mubr.f32.mxu1 %v7241_v45 }
  0xd5   :  { %4669 = vmatmul.mubr.f32.gmra.mrb[42].mxu0 %v733_v17  ;;  %v7251_v17 = vld [vmem:[#allocation6_spill] sm:$0xff] }
  0xd6   :  { %4671 = vmatprep.mubr.f32.mxu0 %v743_v63  ;;  %v7255_v63 = vld [vmem:[#allocation56_spill] sm:$0xff] }
  0xd7   :  { %4497 = vmatmul.mubr.f32.gmra.mrb[34].mxu1 %v7242_v38 }
  0xd8   :  { %4499 = vmatprep.mubr.f32.mxu1 %v7243_v52 }
  0xd9   :  { %4672 = vmatmul.mubr.f32.gmra.mrb[44].mxu0 %v753_v20  ;;  %v7256_v20 = vld [vmem:[#allocation57_spill] sm:$0xff] }
  0xda   :  { %4674 = vmatprep.mubr.f32.mxu0 %v763_v3  ;;  %v7247_v3 = vld [vmem:[#allocation50_spill] sm:$0xff] }
  0xdb   :  { %4500 = vmatmul.mubr.f32.gmra.mrb[36].mxu1 %v7244_v10 }
  0xdc   :  { %4502 = vmatprep.mubr.f32.mxu1 %v7245_v61 }
  0xdd   :  { %4675 = vmatmul.mubr.f32.gmra.mrb[46].mxu0 %v773_v23  ;;  %v7258_v23 = vld [vmem:[#allocation59_spill] sm:$0xff] }
  0xde   :  { %4677 = vmatprep.mubr.f32.mxu0 %v783_v9  ;;  %v2916_v9 = vld [vmem:[%s6960_s2 + $0x80] sm:$0xff] }
  0xdf   :  { %4503 = vmatmul.mubr.f32.gmra.mrb[38].mxu1 %v7246_v36 }
  0xe0   :  { %4505 = vmatprep.mubr.f32.mxu1 %v7247_v3 }
  0xe1   :  { %4678 = vmatmul.mubr.f32.gmra.mrb[48].mxu0 %v793_v37  ;;  %v2917_v37 = vld [vmem:[%s6960_s2 + $0x88] sm:$0xff] }
  0xe2   :  { %4680 = vmatprep.mubr.f32.mxu0 %v803_v31  ;;  %v2960_v31 = vpack.c.bf16 %v2917_v37, %v2916_v9  ;;  %v2902_v9 = vld [vmem:[%s6960_s2 + $0x10] sm:$0xff]  ;;  %v2962_v37 = vpack.c.bf16 %v2921_v0, %v2920_v57  ;;  %v2924_v0 = vld [vmem:[%s6960_s2 + $0xc0] sm:$0xff] }
  0xe3   :  { %4506 = vmatmul.mubr.f32.gmra.mrb[40].mxu1 %v7248_v5 }
  0xe4   :  { %4508 = vmatprep.mubr.f32.mxu1 %v7250_v6 }
  0xe5   :  { %4681 = vmatmul.mubr.f32.gmra.mrb[50].mxu0 %v813_v60  ;;  %v7090_v60 = vmov 0  }
  0xe6   :  { %4685 = vmatprep.mubr.f32.mxu0 %v7249_v53  ;;  %5108 = vset.pattern.permute.xlu0 %v7090_v60 }
  0xe7   :  { %4509 = vmatmul.mubr.f32.gmra.mrb[42].mxu1 %v7252_v41  ;;  %3020 = vperm.xlu0 %5108, %v2960_v31   ;;  %v2903_v31 = vld [vmem:[%s6960_s2 + $0x18] sm:$0xff] }
  0xe8   :  { %4511 = vmatprep.mubr.f32.mxu1 %v7253_v16  ;;  %5109 = vset.pattern.permute.xlu1 %v7090_v60  ;;  %v2953_v34 = vpack.c.bf16 %v2903_v31, %v2902_v9  ;;  %v2925_v9 = vld [vmem:[%s6960_s2 + $0xc8] sm:$0xff]  ;;  %v2940_v60 = vld [vmem:[%s6960_s2 + $0x140] sm:$0xff] }
  0xe9   :  { %4686 = vmatmul.mubr.f32.vlgmr.msra.gmra.mrb[0].mxu0 %v7251_v17  ;;  %3025 = vperm.xlu1 %5109, %v2961_v50   ;;  %v2905_v50 = vld [vmem:[%s6960_s2 + $0x28] sm:$0xff]  ;;  %v2964_v31 = vpack.c.bf16 %v2925_v9, %v2924_v0  ;;  %v2928_v9 = vld [vmem:[%s6960_s2 + $0xe0] sm:$0xff] }
  0xea   :  { %4688 = vmatprep.mubr.f32.mxu0 %v5290_v18  ;;  %4764 = vmatpush3.xpose.msra.mxu0 %v5253_v4  ;;  %v7257_v4 = vld [vmem:[#allocation58_spill] sm:$0xff] }
  0xeb   :  { %4512 = vmatmul.mubr.f32.gmra.mrb[44].mxu1 %v7254_v44  ;;  %2980 = vperm.xlu0 %5108, %v2952_v2   ;;  %v2904_v2 = vld [vmem:[%s6960_s2 + $0x20] sm:$0xff] }
  0xec   :  { %4514 = vmatprep.mubr.f32.mxu1 %v7255_v63  ;;  %v2954_v57 = vpack.c.bf16 %v2905_v50, %v2904_v2  ;;  %v2927_v2 = vld [vmem:[%s6960_s2 + $0xd8] sm:$0xff] }
  0xed   :  { %4689 = vmatmul.mubr.f32.gmra.mrb[2].mxu0 %v5304_v24  ;;  %2985 = vperm.xlu1 %5109, %v2953_v34   ;;  %v2907_v34 = vld [vmem:[%s6960_s2 + $0x38] sm:$0xff]  ;;  %v2965_v50 = vpack.c.bf16 %v2927_v2, %v2926_v13  ;;  %v2930_v2 = vld [vmem:[%s6960_s2 + $0xf0] sm:$0xff] }
  0xee   :  { %4691 = vmatprep.mubr.f32.mxu0 %v5312_v27 }
  0xef   :  { %4515 = vmatmul.mubr.f32.gmra.mrb[46].mxu1 %v7256_v20  ;;  %3030 = vperm.xlu0 %5108, %v2962_v37   ;;  %v2906_v37 = vld [vmem:[%s6960_s2 + $0x30] sm:$0xff] }
  0xf0   :  { %4517 = vmatprep.mubr.f32.mxu1 %v5898_v25  ;;  %v2955_v55 = vpack.c.bf16 %v2907_v34, %v2906_v37  ;;  %v2929_v37 = vld [vmem:[%s6960_s2 + $0xe8] sm:$0xff] }
  0xf1   :  { %4692 = vmatmul.mubr.f32.gmra.mrb[4].mxu0 %v5323_v32  ;;  %2990 = vperm.xlu1 %5109, %v2954_v57   ;;  %v2909_v57 = vld [vmem:[%s6960_s2 + $0x48] sm:$0xff]  ;;  %v2966_v34 = vpack.c.bf16 %v2929_v37, %v2928_v9  ;;  %v2932_v37 = vld [vmem:[%s6960_s2 + $0x100] sm:$0xff] }
  0xf2   :  { %4694 = vmatprep.mubr.f32.mxu0 %v5332_v35 }
  0xf3   :  { %4518 = vmatmul.mubr.f32.gmra.mrb[48].mxu1 %v7257_v4  ;;  %3035 = vperm.xlu0 %5108, %v2963_v30   ;;  %v2908_v30 = vld [vmem:[%s6960_s2 + $0x40] sm:$0xff] }
  0xf4   :  { %4520 = vmatprep.mubr.f32.mxu1 %v5923_v46  ;;  %v2956_v0 = vpack.c.bf16 %v2909_v57, %v2908_v30  ;;  %v2931_v30 = vld [vmem:[%s6960_s2 + $0xf8] sm:$0xff] }
  0xf5   :  { %4695 = vmatmul.mubr.f32.gmra.mrb[6].mxu0 %v5345_v40  ;;  %2995 = vperm.xlu1 %5109, %v2955_v55   ;;  %v2911_v55 = vld [vmem:[%s6960_s2 + $0x58] sm:$0xff]  ;;  %v2967_v57 = vpack.c.bf16 %v2931_v30, %v2930_v2  ;;  %v2937_v2 = vld [vmem:[%s6960_s2 + $0x128] sm:$0xff] }
  0xf6   :  { %4697 = vmatprep.mubr.f32.mxu0 %v5354_v43 }
  0xf7   :  { %4521 = vmatmul.mubr.f32.gmra.mrb[50].mxu1 %v7258_v23  ;;  %3040 = vperm.xlu0 %5108, %v2964_v31   ;;  %v2910_v31 = vld [vmem:[%s6960_s2 + $0x50] sm:$0xff] }
  0xf8   :  { %v2957_v13 = vpack.c.bf16 %v2911_v55, %v2910_v31  ;;  %v2933_v31 = vld [vmem:[%s6960_s2 + $0x108] sm:$0xff] }
  0xf9   :  { %4698 = vmatmul.mubr.f32.gmra.mrb[8].mxu0 %v5368_v49  ;;  %3000 = vperm.xlu1 %5109, %v2956_v0   ;;  %v2913_v0 = vld [vmem:[%s6960_s2 + $0x68] sm:$0xff]  ;;  %v2968_v55 = vpack.c.bf16 %v2933_v31, %v2932_v37  ;;  %v2934_v37 = vld [vmem:[%s6960_s2 + $0x110] sm:$0xff]  ;;  %v2935_v31 = vld [vmem:[%s6960_s2 + $0x118] sm:$0xff] }
  0xfa   :  { %4700 = vmatprep.mubr.f32.mxu0 %v7182_v62 }
  0xfb   :  { %3045 = vperm.xlu0 %5108, %v2965_v50   ;;  %v2912_v50 = vld [vmem:[%s6960_s2 + $0x60] sm:$0xff] }
  0xfc   :  { %v2958_v9 = vpack.c.bf16 %v2913_v0, %v2912_v50  ;;  %v2915_v50 = vld [vmem:[%s6960_s2 + $0x78] sm:$0xff] }
  0xfd   :  { %4701 = vmatmul.mubr.f32.gmra.mrb[10].mxu0 %v7185_v12  ;;  %3005 = vperm.xlu1 %5109, %v2957_v13   ;;  %v2936_v13 = vld [vmem:[%s6960_s2 + $0x120] sm:$0xff] }
  0xfe   :  { %4703 = vmatprep.mubr.f32.mxu0 %v7188_v39  ;;  %v2970_v0 = vpack.c.bf16 %v2937_v2, %v2936_v13  ;;  %v2939_v13 = vld [vmem:[%s6960_s2 + $0x138] sm:$0xff] }
  0xff   :  { %3050 = vperm.xlu0 %5108, %v2966_v34   ;;  %v2914_v34 = vld [vmem:[%s6960_s2 + $0x70] sm:$0xff] }
 0x101   :  { %4704 = vmatmul.mubr.f32.gmra.mrb[12].mxu0 %v7191_v7  ;;  %3010 = vperm.xlu1 %5109, %v2958_v9   ;;  %v2959_v9 = vpack.c.bf16 %v2915_v50, %v2914_v34  ;;  %v2969_v34 = vpack.c.bf16 %v2935_v31, %v2934_v37  ;;  %v2944_v50 = vld [vmem:[%s6960_s2 + $0x160] sm:$0xff]  ;;  %v2942_v31 = vld [vmem:[%s6960_s2 + $0x150] sm:$0xff] }
 0x102   :  { %4706 = vmatprep.mubr.f32.mxu0 %v7194_v29  ;;  %v6300_v30 = vpop.f32.mrb[0].mxu1 }
 0x103   :  { %3055 = vperm.xlu0 %5108, %v2967_v57   ;;  %7259 = vst [vmem:[#allocation7_spill] sm:$0xff] %v6300_v30  ;;  %v6306_v57 = vpop.f32.mrb[1].mxu1  ;;  %v2941_v30 = vld [vmem:[%s6960_s2 + $0x148] sm:$0xff] }
 0x104   :  { %v2972_v2 = vpack.c.bf16 %v2941_v30, %v2940_v60  ;;  %v2943_v60 = vld [vmem:[%s6960_s2 + $0x158] sm:$0xff] }
 0x105   :  { %4707 = vmatmul.mubr.f32.gmra.mrb[14].mxu0 %v7197_v59  ;;  %3015 = vperm.xlu1 %5109, %v2959_v9   ;;  %v2945_v9 = vld [vmem:[%s6960_s2 + $0x168] sm:$0xff] }
 0x106   :  { %4709 = vmatprep.mubr.f32.mxu0 %v7200_v51  ;;  %v2974_v30 = vpack.c.bf16 %v2945_v9, %v2944_v50 }
 0x107   :  { %3060 = vperm.xlu0 %5108, %v2968_v55   ;;  %v2938_v55 = vld [vmem:[%s6960_s2 + $0x130] sm:$0xff] }
 0x108   :  { %v2971_v37 = vpack.c.bf16 %v2939_v13, %v2938_v55  ;;  %v2973_v55 = vpack.c.bf16 %v2943_v60, %v2942_v31  ;;  %v2946_v13 = vld [vmem:[%s6960_s2 + $0x170] sm:$0xff]  ;;  %v2951_v31 = vld [vmem:[%s6960_s2 + $0x198] sm:$0xff] }
 0x109   :  { %4710 = vmatmul.mubr.f32.gmra.mrb[16].mxu0 %v7203_v1  ;;  %3065 = vperm.xlu1 %5109, %v2969_v34   ;;  %v2949_v34 = vld [vmem:[%s6960_s2 + $0x188] sm:$0xff] }
 0x10a   :  { %4712 = vmatprep.mubr.f32.mxu0 %v7206_v28 }
 0x10b   :  { %3070 = vperm.xlu0 %5108, %v2970_v0   ;;  %v2948_v0 = vld [vmem:[%s6960_s2 + $0x180] sm:$0xff] }
 0x10c   :  { %v2976_v50 = vpack.c.bf16 %v2949_v34, %v2948_v0 }
 0x10d   :  { %4713 = vmatmul.mubr.f32.gmra.mrb[18].mxu0 %v7209_v33  ;;  %3075 = vperm.xlu1 %5109, %v2971_v37   ;;  %v2950_v37 = vld [vmem:[%s6960_s2 + $0x190] sm:$0xff] }
 0x10e   :  { %4715 = vmatprep.mubr.f32.mxu0 %v7212_v26  ;;  %v2977_v60 = vpack.c.bf16 %v2951_v31, %v2950_v37 }
 0x10f   :  { %3080 = vperm.xlu0 %5108, %v2972_v2   ;;  %v2947_v2 = vld [vmem:[%s6960_s2 + $0x178] sm:$0xff] }
 0x110   :  { %v2975_v9 = vpack.c.bf16 %v2947_v2, %v2946_v13 }
 0x111   :  { %4716 = vmatmul.mubr.f32.gmra.mrb[20].mxu0 %v7215_v22  ;;  %3085 = vperm.xlu1 %5109, %v2973_v55  }
 0x112   :  { %4718 = vmatprep.mubr.f32.mxu0 %v7218_v48 }
 0x113   :  { %3090 = vperm.xlu0 %5108, %v2974_v30   ;;  %v7268_v30 = vld [vmem:[#allocation7_spill] sm:$0xff] }
 0x115   :  { %4719 = vmatmul.mubr.f32.gmra.mrb[22].mxu0 %v7220_v56  ;;  %3095 = vperm.xlu1 %5109, %v2975_v9  }
 0x116   :  { %4721 = vmatprep.mubr.f32.mxu0 %v7222_v8 }
 0x117   :  { %3100 = vperm.xlu0 %5108, %v2976_v50  }
 0x119   :  { %4722 = vmatmul.mubr.f32.gmra.mrb[24].mxu0 %v7224_v54  ;;  %3105 = vperm.xlu1 %5109, %v2977_v60  }
 0x11a   :  { %4724 = vmatprep.mubr.f32.mxu0 %v7227_v11 }
 0x11d   :  { %4725 = vmatmul.mubr.f32.gmra.mrb[26].mxu0 %v7229_v19 }
 0x11e   :  { %4727 = vmatprep.mubr.f32.mxu0 %v7231_v42 }
 0x121   :  { %4728 = vmatmul.mubr.f32.gmra.mrb[28].mxu0 %v7233_v47 }
 0x122   :  { %4730 = vmatprep.mubr.f32.mxu0 %v7235_v14 }
 0x125   :  { %4731 = vmatmul.mubr.f32.gmra.mrb[30].mxu0 %v7237_v58 }
 0x126   :  { %4733 = vmatprep.mubr.f32.mxu0 %v7239_v15 }
 0x129   :  { %4734 = vmatmul.mubr.f32.gmra.mrb[32].mxu0 %v7240_v21 }
 0x12a   :  { %4736 = vmatprep.mubr.f32.mxu0 %v7241_v45 }
 0x12d   :  { %4737 = vmatmul.mubr.f32.gmra.mrb[34].mxu0 %v7242_v38 }
 0x12e   :  { %4739 = vmatprep.mubr.f32.mxu0 %v7243_v52 }
 0x131   :  { %4740 = vmatmul.mubr.f32.gmra.mrb[36].mxu0 %v7244_v10 }
 0x132   :  { %4742 = vmatprep.mubr.f32.mxu0 %v7245_v61 }
 0x135   :  { %4743 = vmatmul.mubr.f32.gmra.mrb[38].mxu0 %v7246_v36 }
 0x136   :  { %4745 = vmatprep.mubr.f32.mxu0 %v7247_v3 }
 0x139   :  { %4746 = vmatmul.mubr.f32.gmra.mrb[40].mxu0 %v7248_v5 }
 0x13a   :  { %4748 = vmatprep.mubr.f32.mxu0 %v7250_v6 }
 0x13d   :  { %4749 = vmatmul.mubr.f32.gmra.mrb[42].mxu0 %v7252_v41 }
 0x13e   :  { %4751 = vmatprep.mubr.f32.mxu0 %v7253_v16 }
 0x141   :  { %4752 = vmatmul.mubr.f32.gmra.mrb[44].mxu0 %v7254_v44 }
 0x142   :  { %4754 = vmatprep.mubr.f32.mxu0 %v7255_v63 }
 0x145   :  { %4755 = vmatmul.mubr.f32.gmra.mrb[46].mxu0 %v7256_v20 }
 0x146   :  { %4757 = vmatprep.mubr.f32.mxu0 %v5898_v25 }
 0x149   :  { %4758 = vmatmul.mubr.f32.gmra.mrb[48].mxu0 %v7257_v4 }
 0x14a   :  { %4760 = vmatprep.mubr.f32.mxu0 %v5923_v46 }
 0x14d   :  { %4761 = vmatmul.mubr.f32.gmra.mrb[50].mxu0 %v7258_v23 }
 0x14e   :  { %4765 = vmatprep.mubr.f32.mxu0 %v7249_v53 }
 0x151   :  { %4766 = vmatmul.mubr.f32.vlgmr.msra.gmra.mrb[0].mxu0 %v7251_v17 }
 0x152   :  { %4768 = vmatprep.mubr.f32.mxu0 %v5290_v18 }
 0x155   :  { %4769 = vmatmul.mubr.f32.gmra.mrb[2].mxu0 %v5304_v24 }
 0x156   :  { %4771 = vmatprep.mubr.f32.mxu0 %v5312_v27 }
 0x159   :  { %4772 = vmatmul.mubr.f32.gmra.mrb[4].mxu0 %v5323_v32 }
 0x15a   :  { %4774 = vmatprep.mubr.f32.mxu0 %v5332_v35 }
 0x15d   :  { %4775 = vmatmul.mubr.f32.gmra.mrb[6].mxu0 %v5345_v40 }
 0x15e   :  { %4777 = vmatprep.mubr.f32.mxu0 %v5354_v43 }
 0x161   :  { %4778 = vmatmul.mubr.f32.gmra.mrb[8].mxu0 %v5368_v49 }
 0x162   :  { %4780 = vmatprep.mubr.f32.mxu0 %v7182_v62 }
 0x165   :  { %4781 = vmatmul.mubr.f32.gmra.mrb[10].mxu0 %v7185_v12 }
 0x166   :  { %4783 = vmatprep.mubr.f32.mxu0 %v7188_v39 }
 0x169   :  { %4784 = vmatmul.mubr.f32.gmra.mrb[12].mxu0 %v7191_v7 }
 0x16a   :  { %4786 = vmatprep.mubr.f32.mxu0 %v7194_v29  ;;  %v6382_v18 = vpop.f32.mrb[2].mxu1 }
 0x16b   :  { %v6385_v24 = vpop.f32.mrb[3].mxu1 }
 0x16d   :  { %4787 = vmatmul.mubr.f32.gmra.mrb[14].mxu0 %v7197_v59 }
 0x16e   :  { %4789 = vmatprep.mubr.f32.mxu0 %v7200_v51  ;;  %v6388_v27 = vpop.f32.mrb[4].mxu1 }
 0x16f   :  { %v6391_v32 = vpop.f32.mrb[5].mxu1 }
 0x171   :  { %4790 = vmatmul.mubr.f32.gmra.mrb[16].mxu0 %v7203_v1 }
 0x172   :  { %4792 = vmatprep.mubr.f32.mxu0 %v7206_v28  ;;  %v6394_v35 = vpop.f32.mrb[6].mxu1 }
 0x173   :  { %v6397_v40 = vpop.f32.mrb[7].mxu1 }
 0x175   :  { %4793 = vmatmul.mubr.f32.gmra.mrb[18].mxu0 %v7209_v33 }
 0x176   :  { %4795 = vmatprep.mubr.f32.mxu0 %v7212_v26  ;;  %v6400_v43 = vpop.f32.mrb[8].mxu1 }
 0x177   :  { %v6403_v49 = vpop.f32.mrb[9].mxu1 }
 0x179   :  { %4796 = vmatmul.mubr.f32.gmra.mrb[20].mxu0 %v7215_v22 }
 0x17a   :  { %4798 = vmatprep.mubr.f32.mxu0 %v7218_v48  ;;  %v6406_v62 = vpop.f32.mrb[10].mxu1 }
 0x17b   :  { %v6409_v12 = vpop.f32.mrb[11].mxu1 }
 0x17d   :  { %4799 = vmatmul.mubr.f32.gmra.mrb[22].mxu0 %v7220_v56 }
 0x17e   :  { %4801 = vmatprep.mubr.f32.mxu0 %v7222_v8  ;;  %v6412_v39 = vpop.f32.mrb[12].mxu1 }
 0x17f   :  { %v6415_v7 = vpop.f32.mrb[13].mxu1 }
 0x181   :  { %4802 = vmatmul.mubr.f32.gmra.mrb[24].mxu0 %v7224_v54 }
 0x182   :  { %4804 = vmatprep.mubr.f32.mxu0 %v7227_v11  ;;  %v6418_v29 = vpop.f32.mrb[14].mxu1 }
 0x183   :  { %v6421_v59 = vpop.f32.mrb[15].mxu1 }
 0x185   :  { %4805 = vmatmul.mubr.f32.gmra.mrb[26].mxu0 %v7229_v19 }
 0x186   :  { %4807 = vmatprep.mubr.f32.mxu0 %v7231_v42  ;;  %v6424_v51 = vpop.f32.mrb[16].mxu1 }
 0x187   :  { %v6427_v1 = vpop.f32.mrb[17].mxu1 }
 0x189   :  { %4808 = vmatmul.mubr.f32.gmra.mrb[28].mxu0 %v7233_v47 }
 0x18a   :  { %4810 = vmatprep.mubr.f32.mxu0 %v7235_v14  ;;  %v6430_v28 = vpop.f32.mrb[18].mxu1 }
 0x18b   :  { %v6433_v33 = vpop.f32.mrb[19].mxu1 }
 0x18d   :  { %4811 = vmatmul.mubr.f32.gmra.mrb[30].mxu0 %v7237_v58 }
 0x18e   :  { %4813 = vmatprep.mubr.f32.mxu0 %v7239_v15  ;;  %v6436_v26 = vpop.f32.mrb[20].mxu1 }
 0x18f   :  { %v6439_v22 = vpop.f32.mrb[21].mxu1 }
 0x191   :  { %4814 = vmatmul.mubr.f32.gmra.mrb[32].mxu0 %v7240_v21 }
 0x192   :  { %4816 = vmatprep.mubr.f32.mxu0 %v7241_v45  ;;  %v6442_v48 = vpop.f32.mrb[22].mxu1 }
 0x193   :  { %v6445_v56 = vpop.f32.mrb[23].mxu1 }
 0x195   :  { %4817 = vmatmul.mubr.f32.gmra.mrb[34].mxu0 %v7242_v38 }
 0x196   :  { %4819 = vmatprep.mubr.f32.mxu0 %v7243_v52  ;;  %v6448_v8 = vpop.f32.mrb[24].mxu1 }
 0x197   :  { %v6451_v54 = vpop.f32.mrb[25].mxu1 }
 0x199   :  { %4820 = vmatmul.mubr.f32.gmra.mrb[36].mxu0 %v7244_v10 }
 0x19a   :  { %4822 = vmatprep.mubr.f32.mxu0 %v7245_v61  ;;  %v6454_v11 = vpop.f32.mrb[26].mxu1 }
 0x19b   :  { %v6457_v19 = vpop.f32.mrb[27].mxu1 }
 0x19d   :  { %4823 = vmatmul.mubr.f32.gmra.mrb[38].mxu0 %v7246_v36 }
 0x19e   :  { %4825 = vmatprep.mubr.f32.mxu0 %v7247_v3  ;;  %v6460_v42 = vpop.f32.mrb[28].mxu1 }
 0x19f   :  { %v6463_v47 = vpop.f32.mrb[29].mxu1 }
 0x1a1   :  { %4826 = vmatmul.mubr.f32.gmra.mrb[40].mxu0 %v7248_v5 }
 0x1a2   :  { %4828 = vmatprep.mubr.f32.mxu0 %v7250_v6  ;;  %v6466_v14 = vpop.f32.mrb[30].mxu1 }
 0x1a3   :  { %v6469_v58 = vpop.f32.mrb[31].mxu1 }
 0x1a5   :  { %4829 = vmatmul.mubr.f32.gmra.mrb[42].mxu0 %v7252_v41 }
 0x1a6   :  { %4831 = vmatprep.mubr.f32.mxu0 %v7253_v16  ;;  %v6472_v15 = vpop.f32.mrb[32].mxu1 }
 0x1a7   :  { %v6475_v21 = vpop.f32.mrb[33].mxu1 }
 0x1a9   :  { %4832 = vmatmul.mubr.f32.gmra.mrb[44].mxu0 %v7254_v44 }
 0x1aa   :  { %4834 = vmatprep.mubr.f32.mxu0 %v7255_v63  ;;  %v6478_v45 = vpop.f32.mrb[34].mxu1 }
 0x1ab   :  { %v6481_v38 = vpop.f32.mrb[35].mxu1 }
 0x1ad   :  { %4835 = vmatmul.mubr.f32.gmra.mrb[46].mxu0 %v7256_v20 }
 0x1ae   :  { %4837 = vmatprep.mubr.f32.mxu0 %v5898_v25  ;;  %v6484_v52 = vpop.f32.mrb[36].mxu1 }
 0x1af   :  { %v6487_v10 = vpop.f32.mrb[37].mxu1 }
 0x1b1   :  { %4838 = vmatmul.mubr.f32.gmra.mrb[48].mxu0 %v7257_v4  ;;  %v5112_v4 = vld [vmem:[%s6961_s3 + $0x4] ss:$16 sps:$4 sm:$0xff]  }
 0x1b2   :  { %4840 = vmatprep.mubr.f32.mxu0 %v5923_v46  ;;  %v6490_v61 = vpop.f32.mrb[38].mxu1  ;;  %3531 = vmatprep.mubr.bf16.mxu1 %v5112_v4 }
 0x1b3   :  { %v6493_v36 = vpop.f32.mrb[39].mxu1 }
 0x1b5   :  { %4841 = vmatmul.mubr.f32.gmra.mrb[50].mxu0 %v7258_v23 }
 0x1b6   :  { %v6495_v3 = vpop.f32.mrb[40].mxu1 }
 0x1b7   :  { %v6497_v5 = vpop.f32.mrb[41].mxu1 }
 0x1ba   :  { %v6499_v53 = vpop.f32.mrb[42].mxu1 }
 0x1bb   :  { %v6501_v25 = vpop.f32.mrb[43].mxu1 }
 0x1be   :  { %v6503_v6 = vpop.f32.mrb[44].mxu1 }
 0x1bf   :  { %7260 = vst [vmem:[#allocation20_spill] sm:$0xff] %v6503_v6  ;;  %v6505_v17 = vpop.f32.mrb[45].mxu1 }
 0x1c0   :  { %7261 = vst [vmem:[#allocation8_spill] sm:$0xff] %v6505_v17  ;;  %v7269_v17 = vmov 0  }
 0x1c2   :  { %v6507_v41 = vpop.f32.mrb[46].mxu1 }
 0x1c3   :  { %7262 = vst [vmem:[#allocation22_spill] sm:$0xff] %v6507_v41  ;;  %v6509_v46 = vpop.f32.mrb[47].mxu1 }
 0x1c4   :  { %7263 = vst [vmem:[#allocation9_spill] sm:$0xff] %v6509_v46 }
 0x1c6   :  { %v6511_v16 = vpop.f32.mrb[48].mxu1 }
 0x1c7   :  { %7264 = vst [vmem:[#allocation25_spill] sm:$0xff] %v6511_v16  ;;  %v6513_v44 = vpop.f32.mrb[49].mxu1 }
 0x1c8   :  { %7265 = vst [vmem:[#allocation10_spill] sm:$0xff] %v6513_v44 }
 0x1ca   :  { %v6515_v63 = vpop.f32.mrb[50].mxu1 }
 0x1cb   :  { %7266 = vst [vmem:[#allocation26_spill] sm:$0xff] %v6515_v63  ;;  %v6517_v20 = vpop.f32.mrb[51].mxu1 }
 0x1cc   :  { %7267 = vst [vmem:[#allocation11_spill] sm:$0xff] %v6517_v20 }
 0x224   :  { %v4767_v23 = vpop.f32.mrb[0].mxu0 }
 0x225   :  { %v4845_v0 = vadd.f32 %v4767_v23, %v7268_v30  ;;  %v2564_v34 = vpop.f32.mrb[1].mxu0 }
 0x226   :  { %v4846_v55 = vadd.f32 %v2564_v34, %v6306_v57 }
 0x228   :  { %v2874_v13 = vpack.c.bf16 %v4845_v0, %v4846_v55  ;;  %v4770_v2 = vpop.f32.mrb[2].mxu0  ;;  %v3021_v55 = vpop.permute.xlu0 %3020 }
 0x229   :  { %v4847_v50 = vadd.f32 %v4770_v2, %v6382_v18  ;;  %v2576_v9 = vpop.f32.mrb[3].mxu0 }
 0x22a   :  { %v4848_v37 = vadd.f32 %v2576_v9, %v6385_v24 }
 0x22c   :  { %v2875_v31 = vpack.c.bf16 %v4847_v50, %v4848_v37  ;;  %v4773_v60 = vpop.f32.mrb[4].mxu0  ;;  %v3026_v50 = vpop.permute.xlu1 %3025 }
 0x22d   :  { %v6527_v20 = vadd.f32 %v4773_v60, %v6388_v27  ;;  %v2588_v63 = vpop.f32.mrb[5].mxu0 }
 0x22e   :  { %v6530_v4 = vadd.f32 %v2588_v63, %v6391_v32 }
 0x230   :  { %v2876_v23 = vpack.c.bf16 %v6527_v20, %v6530_v4  ;;  %v4776_v57 = vpop.f32.mrb[6].mxu0 }
 0x231   :  { %v6535_v30 = vadd.f32 %v4776_v57, %v6394_v35  ;;  %v2600_v18 = vpop.f32.mrb[7].mxu0  ;;  %v2981_v57 = vpop.permute.xlu0 %2980 }
 0x232   :  { %v6538_v0 = vadd.f32 %v2600_v18, %v6397_v40  ;;  %v2986_v18 = vpop.permute.xlu1 %2985  ;;  %v3108_v44 = vadd.bf16 %v2981_v57, %v2874_v13 }
 0x234   :  { %v4779_v27 = vpop.f32.mrb[8].mxu0 }
 0x235   :  { %v6543_v34 = vadd.f32 %v4779_v27, %v6400_v43  ;;  %v2612_v32 = vpop.f32.mrb[9].mxu0 }
 0x236   :  { %v6546_v63 = vadd.f32 %v2612_v32, %v6403_v49  ;;  %v2991_v43 = vpop.permute.xlu1 %2990 }
 0x238   :  { %v4782_v35 = vpop.f32.mrb[10].mxu0 }
 0x239   :  { %v6551_v2 = vadd.f32 %v4782_v35, %v6406_v62  ;;  %v2624_v40 = vpop.f32.mrb[11].mxu0 }
 0x23a   :  { %v6554_v9 = vadd.f32 %v2624_v40, %v6409_v12  ;;  %v2996_v46 = vpop.permute.xlu1 %2995 }
 0x23c   :  { %v4785_v37 = vpop.f32.mrb[12].mxu0 }
 0x23d   :  { %v6559_v49 = vadd.f32 %v4785_v37, %v6412_v39  ;;  %v2636_v60 = vpop.f32.mrb[13].mxu0  ;;  %v3031_v37 = vpop.permute.xlu0 %3030 }
 0x23e   :  { %v6562_v4 = vadd.f32 %v2636_v60, %v6415_v7 }
 0x240   :  { %v4788_v27 = vpop.f32.mrb[14].mxu0 }
 0x241   :  { %v6567_v12 = vadd.f32 %v4788_v27, %v6418_v29  ;;  %v2648_v32 = vpop.f32.mrb[15].mxu0 }
 0x242   :  { %v6570_v35 = vadd.f32 %v2648_v32, %v6421_v59  ;;  %v3036_v32 = vpop.permute.xlu0 %3035 }
 0x244   :  { %v4791_v40 = vpop.f32.mrb[16].mxu0 }
 0x245   :  { %v4861_v7 = vadd.f32 %v4791_v40, %v6424_v51  ;;  %v2660_v60 = vpop.f32.mrb[17].mxu0  ;;  %v3134_v51 = vmax.bf16 %v7269_v17, %v3108_v44  ;;  %v3109_v40 = vadd.bf16 %v2986_v18, %v2875_v31  ;;  %v3001_v31 = vpop.permute.xlu1 %3000 }
 0x246   :  { %v4862_v20 = vadd.f32 %v2660_v60, %v6427_v1 }
 0x247   :  { %v3135_v57 = vmax.bf16 %v7269_v17, %v3109_v40 }
 0x248   :  { %v2882_v62 = vpack.c.bf16 %v4861_v7, %v4862_v20  ;;  %v4794_v24 = vpop.f32.mrb[18].mxu0 }
 0x249   :  { %v4863_v29 = vadd.f32 %v4794_v24, %v6430_v28  ;;  %v2672_v27 = vpop.f32.mrb[19].mxu0 }
 0x24a   :  { %v3116_v16 = vadd.bf16 %v3021_v55, %v2882_v62  ;;  %v4864_v59 = vadd.f32 %v2672_v27, %v6433_v33  ;;  %v3041_v55 = vpop.permute.xlu0 %3040  ;;  %v3110_v62 = vadd.bf16 %v2991_v43, %v2876_v23 }
 0x24c   :  { %v2883_v39 = vpack.c.bf16 %v4863_v29, %v4864_v59  ;;  %v4797_v41 = vpop.f32.mrb[20].mxu0  ;;  %v3142_v6 = vmax.bf16 %v7269_v17, %v3116_v16  ;;  %v3006_v29 = vpop.permute.xlu1 %3005 }
 0x24d   :  { %v4865_v1 = vadd.f32 %v4797_v41, %v6436_v26  ;;  %v2684_v20 = vpop.f32.mrb[21].mxu0 }
 0x24e   :  { %v3117_v7 = vadd.bf16 %v3026_v50, %v2883_v39  ;;  %v4866_v13 = vadd.f32 %v2684_v20, %v6439_v22  ;;  %4269 = vmatprep.subr.bf16.mxu1 %v3142_v6  ;;  %v3136_v50 = vmax.bf16 %v7269_v17, %v3110_v62  ;;  %v7270_v39 = vpack.c.bf16 %v6535_v30, %v6538_v0 }
 0x24f   :  { %4270 = vmatpush3.bf16.msra.mxu1 %v3134_v51  ;;  %v7271_v30 = vpack.c.bf16 %v6543_v34, %v6546_v63 }
 0x250   :  { %v2884_v28 = vpack.c.bf16 %v4865_v1, %v4866_v13  ;;  %v4800_v24 = vpop.f32.mrb[22].mxu0  ;;  %v3143_v33 = vmax.bf16 %v7269_v17, %v3117_v7  ;;  %v3111_v60 = vadd.bf16 %v2996_v46, %v7270_v39 }
 0x251   :  { %v4867_v16 = vadd.f32 %v4800_v24, %v6442_v48  ;;  %v2696_v44 = vpop.f32.mrb[23].mxu0  ;;  %v3112_v46 = vadd.bf16 %v3001_v31, %v7271_v30  ;;  %v7272_v24 = vpack.c.bf16 %v6551_v2, %v6554_v9  ;;  %v7273_v31 = vpack.c.bf16 %v6559_v49, %v6562_v4 }
 0x252   :  { %v3118_v18 = vadd.bf16 %v3031_v37, %v2884_v28  ;;  %v4868_v26 = vadd.f32 %v2696_v44, %v6445_v56  ;;  %4271 = vmatprep.subr.bf16.mxu1 %v3143_v33  ;;  %v3046_v56 = vpop.permute.xlu0 %3045  ;;  %v3137_v40 = vmax.bf16 %v7269_v17, %v3111_v60  ;;  %v3011_v33 = vpop.permute.xlu1 %3010  ;;  %v7274_v49 = vpack.c.bf16 %v6567_v12, %v6570_v35 }
 0x253   :  { %4272 = vmatpush3.bf16.msra.mxu1 %v3135_v57  ;;  %v3138_v28 = vmax.bf16 %v7269_v17, %v3112_v46  ;;  %v3113_v34 = vadd.bf16 %v3006_v29, %v7272_v24  ;;  %v3114_v2 = vadd.bf16 %v3011_v33, %v7273_v31  ;;  %v5116_v24 = vld [vmem:[%s6961_s3 + $0x44] ss:$16 sps:$4 sm:$0xff]  }
 0x254   :  { %v2885_v22 = vpack.c.bf16 %v4867_v16, %v4868_v26  ;;  %v4803_v6 = vpop.f32.mrb[24].mxu0  ;;  %v3144_v41 = vmax.bf16 %v7269_v17, %v3118_v18 }
 0x255   :  { %v4869_v23 = vadd.f32 %v4803_v6, %v6448_v8  ;;  %v2708_v48 = vpop.f32.mrb[25].mxu0  ;;  %v3139_v44 = vmax.bf16 %v7269_v17, %v3113_v34  ;;  %v3140_v39 = vmax.bf16 %v7269_v17, %v3114_v2 }
 0x256   :  { %v3119_v43 = vadd.bf16 %v3036_v32, %v2885_v22  ;;  %v4870_v37 = vadd.f32 %v2708_v48, %v6451_v54  ;;  %4273 = vmatprep.subr.bf16.mxu1 %v3144_v41  ;;  %v3051_v13 = vpop.permute.xlu0 %3050  ;;  %v3016_v22 = vpop.permute.xlu1 %3015 }
 0x257   :  { %4274 = vmatpush3.bf16.msra.mxu1 %v3136_v50  ;;  %v3115_v4 = vadd.bf16 %v3016_v22, %v7274_v49  ;;  %v7275_v22 = vld [vmem:[#allocation20_spill] sm:$0xff] }
 0x258   :  { %v2886_v27 = vpack.c.bf16 %v4869_v23, %v4870_v37  ;;  %v4806_v59 = vpop.f32.mrb[26].mxu0  ;;  %v3145_v51 = vmax.bf16 %v7269_v17, %v3119_v43 }
 0x259   :  { %v4871_v8 = vadd.f32 %v4806_v59, %v6454_v11  ;;  %v2720_v0 = vpop.f32.mrb[27].mxu0  ;;  %v3141_v29 = vmax.bf16 %v7269_v17, %v3115_v4 }
 0x25a   :  { %v3120_v32 = vadd.bf16 %v3041_v55, %v2886_v27  ;;  %v4872_v54 = vadd.f32 %v2720_v0, %v6457_v19  ;;  %4275 = vmatprep.subr.bf16.mxu1 %v3145_v51 }
 0x25b   :  { %4276 = vmatpush3.bf16.msra.mxu1 %v3137_v40 }
 0x25c   :  { %v2887_v1 = vpack.c.bf16 %v4871_v8, %v4872_v54  ;;  %v4809_v20 = vpop.f32.mrb[28].mxu0  ;;  %v3146_v7 = vmax.bf16 %v7269_v17, %v3120_v32 }
 0x25d   :  { %v4873_v63 = vadd.f32 %v4809_v20, %v6460_v42  ;;  %v2732_v11 = vpop.f32.mrb[29].mxu0 }
 0x25e   :  { %v3121_v55 = vadd.bf16 %v3046_v56, %v2887_v1  ;;  %v4874_v19 = vadd.f32 %v2732_v11, %v6463_v47  ;;  %4277 = vmatprep.subr.bf16.mxu1 %v3146_v7  ;;  %v3056_v47 = vpop.permute.xlu0 %3055 }
 0x25f   :  { %4278 = vmatpush3.bf16.msra.mxu1 %v3138_v28 }
 0x260   :  { %v2888_v57 = vpack.c.bf16 %v4873_v63, %v4874_v19  ;;  %v4812_v62 = vpop.f32.mrb[30].mxu0  ;;  %v3147_v16 = vmax.bf16 %v7269_v17, %v3121_v55 }
 0x261   :  { %v4875_v9 = vadd.f32 %v4812_v62, %v6466_v14  ;;  %v2744_v42 = vpop.f32.mrb[31].mxu0 }
 0x262   :  { %v3122_v18 = vadd.bf16 %v3051_v13, %v2888_v57  ;;  %v4876_v26 = vadd.f32 %v2744_v42, %v6469_v58  ;;  %4279 = vmatprep.subr.bf16.mxu1 %v3147_v16  ;;  %v3061_v56 = vpop.permute.xlu0 %3060  ;;  %v5119_v42 = vld [vmem:[%s6961_s3 + $0x64] ss:$16 sps:$4 sm:$0xff]  }
 0x263   :  { %4280 = vmatpush3.bf16.msra.mxu1 %v3139_v44 }
 0x264   :  { %v2889_v6 = vpack.c.bf16 %v4875_v9, %v4876_v26  ;;  %v4815_v41 = vpop.f32.mrb[32].mxu0  ;;  %v3148_v50 = vmax.bf16 %v7269_v17, %v3122_v18 }
 0x265   :  { %v4877_v14 = vadd.f32 %v4815_v41, %v6472_v15  ;;  %v2756_v60 = vpop.f32.mrb[33].mxu0  ;;  %v5110_v15 = vld [vmem:[%s6961_s3] ss:$16 sps:$4 sm:$0xff]  }
 0x266   :  { %v3123_v23 = vadd.bf16 %v3056_v47, %v2889_v6  ;;  %v4878_v58 = vadd.f32 %v2756_v60, %v6475_v21  ;;  %4281 = vmatprep.subr.bf16.mxu1 %v3148_v50  ;;  %v5113_v21 = vld [vmem:[%s6961_s3 + $0x24] ss:$16 sps:$4 sm:$0xff]   ;;  %v3071_v20 = vpop.permute.xlu0 %3070  ;;  %v7276_v50 = vld [vmem:[#allocation8_spill] sm:$0xff] }
 0x267   :  { %4282 = vmatpush3.bf16.msra.mxu1 %v3140_v39 }
 0x268   :  { %v2890_v48 = vpack.c.bf16 %v4877_v14, %v4878_v58  ;;  %v4818_v43 = vpop.f32.mrb[34].mxu0  ;;  %v3149_v37 = vmax.bf16 %v7269_v17, %v3123_v23  ;;  %v7277_v23 = vld [vmem:[#allocation22_spill] sm:$0xff] }
 0x269   :  { %v4879_v27 = vadd.f32 %v4818_v43, %v6478_v45  ;;  %v2768_v59 = vpop.f32.mrb[35].mxu0  ;;  %v3066_v45 = vpop.permute.xlu1 %3065 }
 0x26a   :  { %v3124_v12 = vadd.bf16 %v3061_v56, %v2890_v48  ;;  %v4880_v35 = vadd.f32 %v2768_v59, %v6481_v38  ;;  %4283 = vmatprep.subr.bf16.mxu1 %v3149_v37  ;;  %v3081_v44 = vpop.permute.xlu0 %3080  ;;  %v7278_v37 = vld [vmem:[#allocation9_spill] sm:$0xff] }
 0x26b   :  { %4284 = vmatpush3.bf16.msra.mxu1 %v3141_v29  ;;  %v5121_v29 = vld [vmem:[%s6961_s3 + $0x60] ss:$16 sps:$4 sm:$0xff]  }
 0x26c   :  { %v3150_v51 = vmax.bf16 %v7269_v17, %v3124_v12  ;;  %v2891_v40 = vpack.c.bf16 %v4879_v27, %v4880_v35  ;;  %v4821_v30 = vpop.f32.mrb[36].mxu0  ;;  %3636 = vmatprep.subr.bf16.mxu1 %v7269_v17  ;;  %v5122_v27 = vld [vmem:[%s6961_s3 + $0x84] ss:$16 sps:$4 sm:$0xff]  }
 0x26d   :  { %v4881_v46 = vadd.f32 %v4821_v30, %v6484_v52  ;;  %v2780_v38 = vpop.f32.mrb[37].mxu0 }
 0x26e   :  { %v3125_v8 = vadd.bf16 %v3066_v45, %v2891_v40  ;;  %v4882_v0 = vadd.f32 %v2780_v38, %v6487_v10  ;;  %3532 = vmatmul.mubr.bf16.vlgmr.msra.gmra.mrb[52].mxu1 %v5110_v15  ;;  %v5115_v10 = vld [vmem:[%s6961_s3 + $0x20] ss:$16 sps:$4 sm:$0xff]   ;;  %v3091_v60 = vpop.permute.xlu0 %3090 }
 0x26f   :  { %3637 = vmatpush1.bf16.msra.mxu1 %v3150_v51  ;;  %3539 = vmatprep.mubr.bf16.mxu1 %v5113_v21  ;;  %v7279_v21 = vld [vmem:[#allocation25_spill] sm:$0xff]  ;;  %v7280_v45 = vld [vmem:[#allocation10_spill] sm:$0xff] }
 0x270   :  { %v3151_v32 = vmax.bf16 %v7269_v17, %v3125_v8  ;;  %v2892_v54 = vpack.c.bf16 %v4881_v46, %v4882_v0  ;;  %v4824_v1 = vpop.f32.mrb[38].mxu0  ;;  %3638 = vmatprep.subr.bf16.mxu1 %v7269_v17 }
 0x271   :  { %v4883_v7 = vadd.f32 %v4824_v1, %v6490_v61  ;;  %v2792_v13 = vpop.f32.mrb[39].mxu0  ;;  %v3076_v61 = vpop.permute.xlu1 %3075 }
 0x272   :  { %v3126_v28 = vadd.bf16 %v3071_v20, %v2892_v54  ;;  %v4884_v52 = vadd.f32 %v2792_v13, %v6493_v36  ;;  %v7281_v54 = vld [vmem:[#allocation26_spill] sm:$0xff]  ;;  %v7282_v13 = vld [vmem:[#allocation11_spill] sm:$0xff] }
 0x273   :  { %3639 = vmatpush1.bf16.msra.mxu1 %v3151_v32  ;;  %v3101_v32 = vpop.permute.xlu0 %3100 }
 0x274   :  { %v3152_v34 = vmax.bf16 %v7269_v17, %v3126_v28  ;;  %v2893_v63 = vpack.c.bf16 %v4883_v7, %v4884_v52  ;;  %v4827_v11 = vpop.f32.mrb[40].mxu0  ;;  %3640 = vmatprep.subr.bf16.mxu1 %v7269_v17  ;;  %v5124_v52 = vld [vmem:[%s6961_s3 + $0x80] ss:$16 sps:$4 sm:$0xff]  }
 0x275   :  { %v4885_v33 = vadd.f32 %v4827_v11, %v6495_v3  ;;  %v2804_v55 = vpop.f32.mrb[41].mxu0 }
 0x276   :  { %v3127_v36 = vadd.bf16 %v3076_v61, %v2893_v63  ;;  %v4886_v19 = vadd.f32 %v2804_v55, %v6497_v5  ;;  %3540 = vmatmul.mubr.bf16.gmra.mrb[56].mxu1 %v5115_v10  ;;  %v5118_v5 = vld [vmem:[%s6961_s3 + $0x40] ss:$16 sps:$4 sm:$0xff]   ;;  %v5125_v10 = vld [vmem:[%s6961_s3 + $0xa4] ss:$16 sps:$4 sm:$0xff]  }
 0x277   :  { %3641 = vmatpush1.bf16.msra.mxu1 %v3152_v34  ;;  %3547 = vmatprep.mubr.bf16.mxu1 %v5116_v24  ;;  %v5128_v55 = vld [vmem:[%s6961_s3 + $0xc4] ss:$16 sps:$4 sm:$0xff]  }
 0x278   :  { %v3153_v57 = vmax.bf16 %v7269_v17, %v3127_v36  ;;  %v2894_v62 = vpack.c.bf16 %v4885_v33, %v4886_v19  ;;  %v4830_v16 = vpop.f32.mrb[42].mxu0  ;;  %3642 = vmatprep.subr.bf16.mxu1 %v7269_v17  ;;  %v5127_v33 = vld [vmem:[%s6961_s3 + $0xa0] ss:$16 sps:$4 sm:$0xff]   ;;  %v5131_v19 = vld [vmem:[%s6961_s3 + $0xe4] ss:$16 sps:$4 sm:$0xff]  }
 0x279   :  { %v4887_v31 = vadd.f32 %v4830_v16, %v6499_v53  ;;  %v2816_v2 = vpop.f32.mrb[43].mxu0  ;;  %v3086_v53 = vpop.permute.xlu1 %3085  ;;  %v5130_v36 = vld [vmem:[%s6961_s3 + $0xc0] ss:$16 sps:$4 sm:$0xff]  }
 0x27a   :  { %v3128_v9 = vadd.bf16 %v3081_v44, %v2894_v62  ;;  %v4888_v3 = vadd.f32 %v2816_v2, %v6501_v25  ;;  %v5134_v62 = vld [vmem:[%s6961_s3 + $0x104] ss:$16 sps:$4 sm:$0xff]   ;;  %v5136_v16 = vld [vmem:[%s6961_s3 + $0x100] ss:$16 sps:$4 sm:$0xff]  }
 0x27b   :  { %3643 = vmatpush1.bf16.msra.mxu1 %v3153_v57  ;;  %v5133_v57 = vld [vmem:[%s6961_s3 + $0xe0] ss:$16 sps:$4 sm:$0xff]   ;;  %v5137_v44 = vld [vmem:[%s6961_s3 + $0x124] ss:$16 sps:$4 sm:$0xff]  }
 0x27c   :  { %v3154_v18 = vmax.bf16 %v7269_v17, %v3128_v9  ;;  %v2895_v26 = vpack.c.bf16 %v4887_v31, %v4888_v3  ;;  %v4833_v47 = vpop.f32.mrb[44].mxu0  ;;  %3644 = vmatprep.subr.bf16.mxu1 %v7269_v17  ;;  %v5139_v31 = vld [vmem:[%s6961_s3 + $0x120] ss:$16 sps:$4 sm:$0xff]   ;;  %v5140_v2 = vld [vmem:[%s6961_s3 + $0x144] ss:$16 sps:$4 sm:$0xff]  }
 0x27d   :  { %v4889_v6 = vadd.f32 %v4833_v47, %v7275_v22  ;;  %v2828_v41 = vpop.f32.mrb[45].mxu0  ;;  %v3096_v15 = vpop.permute.xlu1 %3095  ;;  %v5142_v9 = vld [vmem:[%s6961_s3 + $0x140] ss:$16 sps:$4 sm:$0xff]   ;;  %v5143_v3 = vld [vmem:[%s6961_s3 + $0x164] ss:$16 sps:$4 sm:$0xff]  }
 0x27e   :  { %v3129_v25 = vadd.bf16 %v3086_v53, %v2895_v26  ;;  %v4890_v39 = vadd.f32 %v2828_v41, %v7276_v50  ;;  %3548 = vmatmul.mubr.bf16.gmra.mrb[60].mxu1 %v5118_v5  ;;  %v5145_v5 = vld [vmem:[%s6961_s3 + $0x160] ss:$16 sps:$4 sm:$0xff]   ;;  %v5151_v26 = vld [vmem:[%s6961_s3 + $0xc] ss:$16 sps:$4 sm:$0xff]   ;;  %v5149_v47 = vld [vmem:[%s6961_s3 + $0x8] ss:$16 sps:$4 sm:$0xff]  }
 0x27f   :  { %3645 = vmatpush1.bf16.msra.mxu1 %v3154_v18  ;;  %3555 = vmatprep.mubr.bf16.mxu1 %v5119_v42  ;;  %v5146_v42 = vld [vmem:[%s6961_s3 + $0x184] ss:$16 sps:$4 sm:$0xff]   ;;  %v5148_v18 = vld [vmem:[%s6961_s3 + $0x180] ss:$16 sps:$4 sm:$0xff]   ;;  %v5152_v53 = vld [vmem:[%s6961_s3 + $0x2c] ss:$16 sps:$4 sm:$0xff]  }
 0x280   :  { %v3155_v49 = vmax.bf16 %v7269_v17, %v3129_v25  ;;  %v2896_v4 = vpack.c.bf16 %v4889_v6, %v4890_v39  ;;  %v4836_v14 = vpop.f32.mrb[46].mxu0  ;;  %3646 = vmatprep.subr.bf16.mxu1 %v7269_v17  ;;  %v5154_v22 = vld [vmem:[%s6961_s3 + $0x28] ss:$16 sps:$4 sm:$0xff]   ;;  %v5155_v6 = vld [vmem:[%s6961_s3 + $0x4c] ss:$16 sps:$4 sm:$0xff]  }
 0x281   :  { %v4891_v58 = vadd.f32 %v4836_v14, %v7277_v23  ;;  %v2840_v48 = vpop.f32.mrb[47].mxu0  ;;  %v3106_v63 = vpop.permute.xlu1 %3105  ;;  %v5157_v41 = vld [vmem:[%s6961_s3 + $0x48] ss:$16 sps:$4 sm:$0xff]   ;;  %v5158_v25 = vld [vmem:[%s6961_s3 + $0x6c] ss:$16 sps:$4 sm:$0xff]  }
 0x282   :  { %v3130_v43 = vadd.bf16 %v3091_v60, %v2896_v4  ;;  %v4892_v56 = vadd.f32 %v2840_v48, %v7278_v37  ;;  %v5160_v50 = vld [vmem:[%s6961_s3 + $0x68] ss:$16 sps:$4 sm:$0xff]   ;;  %v5161_v39 = vld [vmem:[%s6961_s3 + $0x8c] ss:$16 sps:$4 sm:$0xff]  }
 0x283   :  { %3647 = vmatpush1.bf16.msra.mxu1 %v3155_v49  ;;  %v5163_v49 = vld [vmem:[%s6961_s3 + $0x88] ss:$16 sps:$4 sm:$0xff]   ;;  %v5164_v4 = vld [vmem:[%s6961_s3 + $0xac] ss:$16 sps:$4 sm:$0xff]  }
 0x284   :  { %v3156_v59 = vmax.bf16 %v7269_v17, %v3130_v43  ;;  %v2897_v12 = vpack.c.bf16 %v4891_v58, %v4892_v56  ;;  %v4839_v35 = vpop.f32.mrb[48].mxu0  ;;  %3648 = vmatprep.subr.bf16.mxu1 %v7269_v17  ;;  %v5166_v14 = vld [vmem:[%s6961_s3 + $0xa8] ss:$16 sps:$4 sm:$0xff]   ;;  %v5167_v60 = vld [vmem:[%s6961_s3 + $0xcc] ss:$16 sps:$4 sm:$0xff]  }
 0x285   :  { %v4893_v51 = vadd.f32 %v4839_v35, %v7279_v21  ;;  %v2852_v40 = vpop.f32.mrb[49].mxu0  ;;  %v5169_v23 = vld [vmem:[%s6961_s3 + $0xc8] ss:$16 sps:$4 sm:$0xff]   ;;  %v5170_v58 = vld [vmem:[%s6961_s3 + $0xec] ss:$16 sps:$4 sm:$0xff]  }
 0x286   :  { %v3131_v30 = vadd.bf16 %v3096_v15, %v2897_v12  ;;  %v4894_v46 = vadd.f32 %v2852_v40, %v7280_v45  ;;  %3556 = vmatmul.mubr.bf16.gmra.mrb[64].mxu1 %v5121_v29  ;;  %v5172_v48 = vld [vmem:[%s6961_s3 + $0xe8] ss:$16 sps:$4 sm:$0xff]   ;;  %v5173_v43 = vld [vmem:[%s6961_s3 + $0x10c] ss:$16 sps:$4 sm:$0xff]  }
 0x287   :  { %3649 = vmatpush1.bf16.msra.mxu1 %v3156_v59  ;;  %3563 = vmatprep.mubr.bf16.mxu1 %v5122_v27  ;;  %v5175_v37 = vld [vmem:[%s6961_s3 + $0x108] ss:$16 sps:$4 sm:$0xff]   ;;  %v5176_v56 = vld [vmem:[%s6961_s3 + $0x12c] ss:$16 sps:$4 sm:$0xff]  }
 0x288   :  { %v3157_v38 = vmax.bf16 %v7269_v17, %v3131_v30  ;;  %v2898_v8 = vpack.c.bf16 %v4893_v51, %v4894_v46  ;;  %v4842_v0 = vpop.f32.mrb[50].mxu0  ;;  %3650 = vmatprep.subr.bf16.mxu1 %v7269_v17  ;;  %v5178_v29 = vld [vmem:[%s6961_s3 + $0x128] ss:$16 sps:$4 sm:$0xff]   ;;  %v5179_v27 = vld [vmem:[%s6961_s3 + $0x14c] ss:$16 sps:$4 sm:$0xff]  }
 0x289   :  { %v4895_v1 = vadd.f32 %v4842_v0, %v7281_v54  ;;  %v2864_v20 = vpop.f32.mrb[51].mxu0  ;;  %v5181_v59 = vld [vmem:[%s6961_s3 + $0x148] ss:$16 sps:$4 sm:$0xff]   ;;  %v5182_v12 = vld [vmem:[%s6961_s3 + $0x16c] ss:$16 sps:$4 sm:$0xff]  }
 0x28a   :  { %v3132_v7 = vadd.bf16 %v3101_v32, %v2898_v8  ;;  %v4896_v28 = vadd.f32 %v2864_v20, %v7282_v13  ;;  %v5184_v35 = vld [vmem:[%s6961_s3 + $0x168] ss:$16 sps:$4 sm:$0xff]   ;;  %v5185_v15 = vld [vmem:[%s6961_s3 + $0x18c] ss:$16 sps:$4 sm:$0xff]  }
 0x28b   :  { %3651 = vmatpush1.bf16.msra.mxu1 %v3157_v38  ;;  %v5187_v21 = vld [vmem:[%s6961_s3 + $0x188] ss:$16 sps:$4 sm:$0xff]  }
 0x28c   :  { %v3158_v24 = vmax.bf16 %v7269_v17, %v3132_v7  ;;  %v2899_v34 = vpack.c.bf16 %v4895_v1, %v4896_v28  ;;  %3652 = vmatprep.subr.bf16.mxu1 %v7269_v17 }
 0x28e   :  { %v3133_v11 = vadd.bf16 %v3106_v63, %v2899_v34  ;;  %3564 = vmatmul.mubr.bf16.gmra.mrb[68].mxu1 %v5124_v52 }
 0x28f   :  { %3653 = vmatpush1.bf16.msra.mxu1 %v3158_v24  ;;  %3571 = vmatprep.mubr.bf16.mxu1 %v5125_v10 }
 0x290   :  { %v3159_v61 = vmax.bf16 %v7269_v17, %v3133_v11  ;;  %3654 = vmatprep.subr.bf16.mxu1 %v7269_v17 }
 0x293   :  { %3655 = vmatpush1.bf16.msra.mxu1 %v3159_v61 }
 0x294   :  { %3828 = vmatprep.subr.bf16.mxu1 %v7269_v17 }
 0x296   :  { %3572 = vmatmul.mubr.bf16.gmra.mrb[72].mxu1 %v5127_v33 }
 0x297   :  { %3579 = vmatprep.mubr.bf16.mxu1 %v5128_v55 }
 0x29e   :  { %3580 = vmatmul.mubr.bf16.gmra.mrb[76].mxu1 %v5130_v36 }
 0x29f   :  { %3587 = vmatprep.mubr.bf16.mxu1 %v5131_v19 }
 0x2a6   :  { %3588 = vmatmul.mubr.bf16.gmra.mrb[80].mxu1 %v5133_v57 }
 0x2a7   :  { %3595 = vmatprep.mubr.bf16.mxu1 %v5134_v62 }
 0x2ae   :  { %3596 = vmatmul.mubr.bf16.gmra.mrb[84].mxu1 %v5136_v16 }
 0x2af   :  { %3603 = vmatprep.mubr.bf16.mxu1 %v5137_v44 }
 0x2b6   :  { %3604 = vmatmul.mubr.bf16.gmra.mrb[88].mxu1 %v5139_v31 }
 0x2b7   :  { %3611 = vmatprep.mubr.bf16.mxu1 %v5140_v2 }
 0x2be   :  { %3612 = vmatmul.mubr.bf16.gmra.mrb[92].mxu1 %v5142_v9 }
 0x2bf   :  { %3619 = vmatprep.mubr.bf16.mxu1 %v5143_v3 }
 0x2c6   :  { %3620 = vmatmul.mubr.bf16.gmra.mrb[96].mxu1 %v5145_v5 }
 0x2c7   :  { %3627 = vmatprep.mubr.bf16.mxu1 %v5146_v42 }
 0x2ce   :  { %3628 = vmatmul.mubr.bf16.gmra.mrb[100].mxu1 %v5148_v18 }
 0x2cf   :  { %3936 = vmatprep.mubr.msk.bf16.mxu1 %vm3459_vm1, %v5151_v26 }
 0x2d6   :  { %3669 = vmatmul.mubr.bf16.vlgmr.msra.gmra.mrb[104].mxu1 %v5149_v47 }
 0x2d7   :  { %3937 = vmatprep.mubr.msk.bf16.mxu1 %vm3459_vm1, %v5152_v53 }
 0x2de   :  { %3677 = vmatmul.mubr.bf16.gmra.mrb[108].mxu1 %v5154_v22 }
 0x2df   :  { %3938 = vmatprep.mubr.msk.bf16.mxu1 %vm3459_vm1, %v5155_v6 }
 0x2e6   :  { %3685 = vmatmul.mubr.bf16.gmra.mrb[112].mxu1 %v5157_v41 }
 0x2e7   :  { %3939 = vmatprep.mubr.msk.bf16.mxu1 %vm3459_vm1, %v5158_v25 }
 0x2ee   :  { %3693 = vmatmul.mubr.bf16.gmra.mrb[116].mxu1 %v5160_v50 }
 0x2ef   :  { %3940 = vmatprep.mubr.msk.bf16.mxu1 %vm3459_vm1, %v5161_v39 }
 0x2f6   :  { %3701 = vmatmul.mubr.bf16.gmra.mrb[120].mxu1 %v5163_v49 }
 0x2f7   :  { %3941 = vmatprep.mubr.msk.bf16.mxu1 %vm3459_vm1, %v5164_v4 }
 0x2fe   :  { %3709 = vmatmul.mubr.bf16.gmra.mrb[124].mxu1 %v5166_v14 }
 0x2ff   :  { %3942 = vmatprep.mubr.msk.bf16.mxu1 %vm3459_vm1, %v5167_v60 }
 0x306   :  { %3717 = vmatmul.mubr.bf16.gmra.mrb[128].mxu1 %v5169_v23 }
 0x307   :  { %3943 = vmatprep.mubr.msk.bf16.mxu1 %vm3459_vm1, %v5170_v58 }
 0x30e   :  { %3725 = vmatmul.mubr.bf16.gmra.mrb[132].mxu1 %v5172_v48 }
 0x30f   :  { %3944 = vmatprep.mubr.msk.bf16.mxu1 %vm3459_vm1, %v5173_v43 }
 0x316   :  { %3733 = vmatmul.mubr.bf16.gmra.mrb[136].mxu1 %v5175_v37 }
 0x317   :  { %3945 = vmatprep.mubr.msk.bf16.mxu1 %vm3459_vm1, %v5176_v56 }
 0x31e   :  { %3741 = vmatmul.mubr.bf16.gmra.mrb[140].mxu1 %v5178_v29 }
 0x31f   :  { %3946 = vmatprep.mubr.msk.bf16.mxu1 %vm3459_vm1, %v5179_v27 }
 0x326   :  { %3749 = vmatmul.mubr.bf16.gmra.mrb[144].mxu1 %v5181_v59 }
 0x327   :  { %3947 = vmatprep.mubr.msk.bf16.mxu1 %vm3459_vm1, %v5182_v12  ;;  %v5213_v12 = vmov 1966171168  }
 0x32e   :  { %3757 = vmatmul.mubr.bf16.gmra.mrb[148].mxu1 %v5184_v35  ;;  %v3810_v35 = vunpack.c.l.s4 %v5213_v12 }
 0x32f   :  { %3948 = vmatprep.mubr.msk.bf16.mxu1 %vm3459_vm1, %v5185_v15  ;;  %v3812_v15 = vlaneseq }
 0x336   :  { %3765 = vmatmul.mubr.bf16.gmra.mrb[152].mxu1 %v5187_v21 }
 0x341   :  { %v4285_v51 = vpop.f32.mrb[52].mxu1 }
 0x342   :  { %v4286_v40 = vpop.f32.mrb[53].mxu1 }
 0x343   :  { %v6828_v30 = vadd.f32 %v4286_v40, %v4285_v51  ;;  %v4288_v45 = vpop.f32.mrb[54].mxu1  ;;  %v3811_v51 = vunpack.c.0.s8 %v3810_v35  ;;  %v3813_v40 = vshrl.u32 %v3812_v15, 7 }
 0x344   :  { %v4289_v46 = vpop.f32.mrb[55].mxu1 }
 0x345   :  { %v6830_v38 = vadd.f32 %v4289_v46, %v4288_v45  ;;  %v6871_v45 = vld.sshfl [vmem:[%s6962_s4] sm:$0x11 pattern:$0x75316420]  ;;  %s5214_s4 = smov [#allocation2]  }
 0x346   :  { %v3808_v46 = vcombine.high %v6871_v45, %v6871_v45  ;;  %s3876_s9 = sshll.u32 %s5214_s4, 4  ;;  %s3877_s9 = int_to_ptr.vmem [resolvable:$true] %s3876_s9 }
 0x347   :  { %s5188_s10 = scalar_lea.vmem %s3877_s9, 16  ;;  %s5192_s11 = scalar_lea.vmem %s3877_s9, 32 }
 0x348   :  { %p5189_p0 = scmp.ne.s32.totalorder %s3877_s9, %s5188_s10  ;;  %p5193_p1 = scmp.lt.s32.totalorder %s3877_s9, %s3877_s9 }
 0x349   :  { %v4291_v8 = vpop.f32.mrb[56].mxu1  ;;  %p5194_p2 = scmp.lt.s32.totalorder %s5192_s11, %s5188_s10 }
 0x34a   :  { %v4292_v0 = vpop.f32.mrb[57].mxu1 }
 0x34b   :  { %v6832_v32 = vadd.f32 %v4292_v0, %v4291_v8  ;;  %v4294_v54 = vpop.f32.mrb[58].mxu1  ;;  %v6875_v8 = vsub.s32 %v3811_v51, %v3813_v40  ;;  %p5195_p3 = por %p5194_p2, %p5193_p1 }
 0x34c   :  { %v4295_v1 = vpop.f32.mrb[59].mxu1 }
 0x34d   :  { %v6834_v20 = vadd.f32 %v4295_v1, %v4294_v54  ;;  %v3815_v1 = vrot.slane %v6871_v45, %v6875_v8  ;;  %p5196_p4 = pnand %p5195_p3, %p5189_p0 }
 0x351   :  { %v4297_v7 = vpop.f32.mrb[60].mxu1 }
 0x352   :  { %v4298_v13 = vpop.f32.mrb[61].mxu1 }
 0x353   :  { %v6836_v28 = vadd.f32 %v4298_v13, %v4297_v7  ;;  %v4300_v52 = vpop.f32.mrb[62].mxu1  ;;  %v3822_v7 = vrot.slane %v3808_v46, %v6875_v8 }
 0x354   :  { %v4301_v10 = vpop.f32.mrb[63].mxu1 }
 0x355   :  { %v6838_v24 = vadd.f32 %v4301_v10, %v4300_v52  ;;  %3950 = vmatprep.mubr.msk.bf16.mxu1 %vm3824_vm2, %v3822_v7 }
 0x359   :  { %v4303_v34 = vpop.f32.mrb[64].mxu1 }
 0x35a   :  { %v4304_v63 = vpop.f32.mrb[65].mxu1 }
 0x35b   :  { %v6840_v11 = vadd.f32 %v4304_v63, %v4303_v34  ;;  %v4306_v61 = vpop.f32.mrb[66].mxu1 }
 0x35c   :  { %v4307_v33 = vpop.f32.mrb[67].mxu1 }
 0x35d   :  { %v6842_v55 = vadd.f32 %v4307_v33, %v4306_v61 }
 0x361   :  { %v4309_v36 = vpop.f32.mrb[68].mxu1 }
 0x362   :  { %v4310_v19 = vpop.f32.mrb[69].mxu1 }
 0x363   :  { %v6844_v57 = vadd.f32 %v4310_v19, %v4309_v36  ;;  %v4312_v62 = vpop.f32.mrb[70].mxu1 }
 0x364   :  { %v4313_v16 = vpop.f32.mrb[71].mxu1 }
 0x365   :  { %v6846_v44 = vadd.f32 %v4313_v16, %v4312_v62 }
 0x369   :  { %v4315_v31 = vpop.f32.mrb[72].mxu1 }
 0x36a   :  { %v4316_v2 = vpop.f32.mrb[73].mxu1 }
 0x36b   :  { %v6848_v9 = vadd.f32 %v4316_v2, %v4315_v31  ;;  %v4318_v3 = vpop.f32.mrb[74].mxu1 }
 0x36c   :  { %v4319_v5 = vpop.f32.mrb[75].mxu1 }
 0x36d   :  { %v6850_v42 = vadd.f32 %v4319_v5, %v4318_v3 }
 0x371   :  { %v4321_v18 = vpop.f32.mrb[76].mxu1 }
 0x372   :  { %v4322_v26 = vpop.f32.mrb[77].mxu1 }
 0x373   :  { %v6852_v47 = vadd.f32 %v4322_v26, %v4321_v18  ;;  %v4324_v53 = vpop.f32.mrb[78].mxu1 }
 0x374   :  { %v4325_v22 = vpop.f32.mrb[79].mxu1 }
 0x375   :  { %v6854_v6 = vadd.f32 %v4325_v22, %v4324_v53 }
 0x379   :  { %v4327_v41 = vpop.f32.mrb[80].mxu1 }
 0x37a   :  { %v4328_v25 = vpop.f32.mrb[81].mxu1 }
 0x37b   :  { %v6856_v50 = vadd.f32 %v4328_v25, %v4327_v41  ;;  %v4330_v39 = vpop.f32.mrb[82].mxu1 }
 0x37c   :  { %v4331_v49 = vpop.f32.mrb[83].mxu1 }
 0x37d   :  { %v6858_v4 = vadd.f32 %v4331_v49, %v4330_v39 }
 0x381   :  { %v4333_v14 = vpop.f32.mrb[84].mxu1 }
 0x382   :  { %v4334_v60 = vpop.f32.mrb[85].mxu1 }
 0x383   :  { %v6860_v23 = vadd.f32 %v4334_v60, %v4333_v14  ;;  %v4336_v58 = vpop.f32.mrb[86].mxu1 }
 0x384   :  { %v4337_v48 = vpop.f32.mrb[87].mxu1 }
 0x385   :  { %v6862_v43 = vadd.f32 %v4337_v48, %v4336_v58 }
 0x389   :  { %v4339_v37 = vpop.f32.mrb[88].mxu1 }
 0x38a   :  { %v4340_v56 = vpop.f32.mrb[89].mxu1 }
 0x38b   :  { %v6864_v29 = vadd.f32 %v4340_v56, %v4339_v37  ;;  %v4342_v27 = vpop.f32.mrb[90].mxu1 }
 0x38c   :  { %v4343_v59 = vpop.f32.mrb[91].mxu1 }
 0x38d   :  { %v6866_v21 = vadd.f32 %v4343_v59, %v4342_v27 }
 0x391   :  { %v4345_v0 = vpop.f32.mrb[92].mxu1 }
 0x392   :  { %v4346_v54 = vpop.f32.mrb[93].mxu1 }
 0x393   :  { %v6880_v13 = vadd.f32 %v4346_v54, %v4345_v0  ;;  %v4348_v52 = vpop.f32.mrb[94].mxu1 }
 0x394   :  { %v4349_v10 = vpop.f32.mrb[95].mxu1 }
 0x395   :  { %v6882_v34 = vadd.f32 %v4349_v10, %v4348_v52 }
 0x399   :  { %v4351_v63 = vpop.f32.mrb[96].mxu1 }
 0x39a   :  { %v4352_v61 = vpop.f32.mrb[97].mxu1 }
 0x39b   :  { %v6884_v33 = vadd.f32 %v4352_v61, %v4351_v63  ;;  %v4354_v36 = vpop.f32.mrb[98].mxu1 }
 0x39c   :  { %v4355_v19 = vpop.f32.mrb[99].mxu1 }
 0x39d   :  { %v6886_v62 = vadd.f32 %v4355_v19, %v4354_v36 }
 0x3a1   :  { %v4357_v16 = vpop.f32.mrb[100].mxu1 }
 0x3a2   :  { %v4358_v31 = vpop.f32.mrb[101].mxu1 }
 0x3a3   :  { %v6888_v2 = vadd.f32 %v4358_v31, %v4357_v16  ;;  %v4360_v3 = vpop.f32.mrb[102].mxu1 }
 0x3a4   :  { %v4361_v5 = vpop.f32.mrb[103].mxu1 }
 0x3a5   :  { %v6890_v18 = vadd.f32 %v4361_v5, %v4360_v3 }
 0x3a9   :  { %v3670_v26 = vpop.f32.mrb[104].mxu1 }
 0x3aa   :  { %v3671_v53 = vadd.f32 %v6828_v30, %v3670_v26  ;;  %v3672_v22 = vpop.f32.mrb[105].mxu1 }
 0x3ab   :  { %v3673_v41 = vpop.f32.mrb[106].mxu1 }
 0x3ac   :  { %v3674_v25 = vadd.f32 %v6830_v38, %v3673_v41  ;;  %v3675_v39 = vpop.f32.mrb[107].mxu1 }
 0x3ae   :  { %v3773_v49 = vpack.c.bf16 %v3674_v25, %v3671_v53 }
 0x3b0   :  { %v3786_v14 = vmax.bf16 %v7269_v17, %v3773_v49 }
 0x3b1   :  { %v3678_v60 = vpop.f32.mrb[108].mxu1 }
 0x3b2   :  { %v3679_v58 = vadd.f32 %v6832_v32, %v3678_v60  ;;  %v3680_v48 = vpop.f32.mrb[109].mxu1  ;;  %3829 = vmatpush1.bf16.msra.mxu1 %v3786_v14 }
 0x3b3   :  { %v3681_v37 = vpop.f32.mrb[110].mxu1  ;;  %3830 = vmatprep.subr.bf16.mxu1 %v7269_v17 }
 0x3b4   :  { %v3682_v56 = vadd.f32 %v6834_v20, %v3681_v37  ;;  %v3683_v27 = vpop.f32.mrb[111].mxu1 }
 0x3b6   :  { %v3774_v30 = vpack.c.bf16 %v3682_v56, %v3679_v58 }
 0x3b8   :  { %v3787_v59 = vmax.bf16 %v7269_v17, %v3774_v30 }
 0x3b9   :  { %v3686_v12 = vpop.f32.mrb[112].mxu1 }
 0x3ba   :  { %v3687_v38 = vadd.f32 %v6836_v28, %v3686_v12  ;;  %v3688_v35 = vpop.f32.mrb[113].mxu1  ;;  %3831 = vmatpush1.bf16.msra.mxu1 %v3787_v59 }
 0x3bb   :  { %v3689_v15 = vpop.f32.mrb[114].mxu1  ;;  %3832 = vmatprep.subr.bf16.mxu1 %v7269_v17 }
 0x3bc   :  { %v3690_v32 = vadd.f32 %v6838_v24, %v3689_v15  ;;  %v3691_v51 = vpop.f32.mrb[115].mxu1 }
 0x3be   :  { %v3775_v40 = vpack.c.bf16 %v3690_v32, %v3687_v38 }
 0x3c0   :  { %v3788_v46 = vmax.bf16 %v7269_v17, %v3775_v40 }
 0x3c1   :  { %v3694_v0 = vpop.f32.mrb[116].mxu1 }
 0x3c2   :  { %v3695_v20 = vadd.f32 %v6840_v11, %v3694_v0  ;;  %v3696_v54 = vpop.f32.mrb[117].mxu1  ;;  %3833 = vmatpush1.bf16.msra.mxu1 %v3788_v46 }
 0x3c3   :  { %v3697_v7 = vpop.f32.mrb[118].mxu1  ;;  %3834 = vmatprep.subr.bf16.mxu1 %v7269_v17 }
 0x3c4   :  { %v3698_v28 = vadd.f32 %v6842_v55, %v3697_v7  ;;  %v3699_v52 = vpop.f32.mrb[119].mxu1 }
 0x3c6   :  { %v3776_v10 = vpack.c.bf16 %v3698_v28, %v3695_v20 }
 0x3c8   :  { %v3789_v63 = vmax.bf16 %v7269_v17, %v3776_v10 }
 0x3c9   :  { %v3702_v61 = vpop.f32.mrb[120].mxu1 }
 0x3ca   :  { %v3703_v24 = vadd.f32 %v6844_v57, %v3702_v61  ;;  %v3704_v36 = vpop.f32.mrb[121].mxu1  ;;  %3835 = vmatpush1.bf16.msra.mxu1 %v3789_v63 }
 0x3cb   :  { %v3705_v19 = vpop.f32.mrb[122].mxu1  ;;  %3836 = vmatprep.subr.bf16.mxu1 %v7269_v17 }
 0x3cc   :  { %v3706_v11 = vadd.f32 %v6846_v44, %v3705_v19  ;;  %v3707_v16 = vpop.f32.mrb[123].mxu1 }
 0x3ce   :  { %v3777_v31 = vpack.c.bf16 %v3706_v11, %v3703_v24 }
 0x3d0   :  { %v3790_v3 = vmax.bf16 %v7269_v17, %v3777_v31 }
 0x3d1   :  { %v3710_v5 = vpop.f32.mrb[124].mxu1 }
 0x3d2   :  { %v3711_v55 = vadd.f32 %v6848_v9, %v3710_v5  ;;  %v3712_v26 = vpop.f32.mrb[125].mxu1  ;;  %3837 = vmatpush1.bf16.msra.mxu1 %v3790_v3 }
 0x3d3   :  { %v3713_v53 = vpop.f32.mrb[126].mxu1  ;;  %3838 = vmatprep.subr.bf16.mxu1 %v7269_v17 }
 0x3d4   :  { %v3714_v57 = vadd.f32 %v6850_v42, %v3713_v53  ;;  %v3715_v22 = vpop.f32.mrb[127].mxu1 }
 0x3d6   :  { %v3778_v41 = vpack.c.bf16 %v3714_v57, %v3711_v55 }
 0x3d8   :  { %v3791_v25 = vmax.bf16 %v7269_v17, %v3778_v41 }
 0x3d9   :  { %v3718_v39 = vpop.f32.mrb[128].mxu1 }
 0x3da   :  { %v3719_v44 = vadd.f32 %v6852_v47, %v3718_v39  ;;  %v3720_v49 = vpop.f32.mrb[129].mxu1  ;;  %3839 = vmatpush1.bf16.msra.mxu1 %v3791_v25 }
 0x3db   :  { %v3721_v14 = vpop.f32.mrb[130].mxu1  ;;  %3840 = vmatprep.subr.bf16.mxu1 %v7269_v17 }
 0x3dc   :  { %v3722_v9 = vadd.f32 %v6854_v6, %v3721_v14  ;;  %v3723_v60 = vpop.f32.mrb[131].mxu1 }
 0x3de   :  { %v3779_v58 = vpack.c.bf16 %v3722_v9, %v3719_v44 }
 0x3e0   :  { %v3792_v48 = vmax.bf16 %v7269_v17, %v3779_v58 }
 0x3e1   :  { %v3726_v37 = vpop.f32.mrb[132].mxu1 }
 0x3e2   :  { %v3727_v42 = vadd.f32 %v6856_v50, %v3726_v37  ;;  %v3728_v56 = vpop.f32.mrb[133].mxu1  ;;  %3841 = vmatpush1.bf16.msra.mxu1 %v3792_v48 }
 0x3e3   :  { %v3729_v27 = vpop.f32.mrb[134].mxu1  ;;  %3842 = vmatprep.subr.bf16.mxu1 %v7269_v17 }
 0x3e4   :  { %v3730_v47 = vadd.f32 %v6858_v4, %v3729_v27  ;;  %v3731_v30 = vpop.f32.mrb[135].mxu1 }
 0x3e6   :  { %v3780_v59 = vpack.c.bf16 %v3730_v47, %v3727_v42 }
 0x3e8   :  { %v3793_v12 = vmax.bf16 %v7269_v17, %v3780_v59 }
 0x3e9   :  { %v3734_v38 = vpop.f32.mrb[136].mxu1 }
 0x3ea   :  { %v3735_v6 = vadd.f32 %v6860_v23, %v3734_v38  ;;  %v3736_v35 = vpop.f32.mrb[137].mxu1  ;;  %3843 = vmatpush1.bf16.msra.mxu1 %v3793_v12 }
 0x3eb   :  { %v3737_v15 = vpop.f32.mrb[138].mxu1  ;;  %3844 = vmatprep.subr.bf16.mxu1 %v7269_v17 }
 0x3ec   :  { %v3738_v50 = vadd.f32 %v6862_v43, %v3737_v15  ;;  %v3739_v32 = vpop.f32.mrb[139].mxu1 }
 0x3ee   :  { %v3781_v51 = vpack.c.bf16 %v3738_v50, %v3735_v6 }
 0x3f0   :  { %v3794_v40 = vmax.bf16 %v7269_v17, %v3781_v51 }
 0x3f1   :  { %v3742_v46 = vpop.f32.mrb[140].mxu1 }
 0x3f2   :  { %v3743_v4 = vadd.f32 %v6864_v29, %v3742_v46  ;;  %v3744_v0 = vpop.f32.mrb[141].mxu1  ;;  %3845 = vmatpush1.bf16.msra.mxu1 %v3794_v40 }
 0x3f3   :  { %v3745_v20 = vpop.f32.mrb[142].mxu1  ;;  %3846 = vmatprep.subr.bf16.mxu1 %v7269_v17 }
 0x3f4   :  { %v3746_v23 = vadd.f32 %v6866_v21, %v3745_v20  ;;  %v3747_v54 = vpop.f32.mrb[143].mxu1 }
 0x3f6   :  { %v3782_v7 = vpack.c.bf16 %v3746_v23, %v3743_v4 }
 0x3f8   :  { %v3795_v28 = vmax.bf16 %v7269_v17, %v3782_v7 }
 0x3f9   :  { %v3750_v52 = vpop.f32.mrb[144].mxu1 }
 0x3fa   :  { %v3751_v43 = vadd.f32 %v6880_v13, %v3750_v52  ;;  %v3752_v10 = vpop.f32.mrb[145].mxu1  ;;  %3847 = vmatpush1.bf16.msra.mxu1 %v3795_v28 }
 0x3fb   :  { %v3753_v63 = vpop.f32.mrb[146].mxu1  ;;  %3848 = vmatprep.subr.bf16.mxu1 %v7269_v17 }
 0x3fc   :  { %v3754_v29 = vadd.f32 %v6882_v34, %v3753_v63  ;;  %v3755_v61 = vpop.f32.mrb[147].mxu1 }
 0x3fe   :  { %v3783_v24 = vpack.c.bf16 %v3754_v29, %v3751_v43 }
 0x400   :  { %v3796_v36 = vmax.bf16 %v7269_v17, %v3783_v24 }
 0x401   :  { %v3758_v19 = vpop.f32.mrb[148].mxu1 }
 0x402   :  { %v3759_v21 = vadd.f32 %v6884_v33, %v3758_v19  ;;  %v3760_v11 = vpop.f32.mrb[149].mxu1  ;;  %3849 = vmatpush1.bf16.msra.mxu1 %v3796_v36 }
 0x403   :  { %v3761_v16 = vpop.f32.mrb[150].mxu1  ;;  %3850 = vmatprep.subr.bf16.mxu1 %v7269_v17 }
 0x404   :  { %v3762_v13 = vadd.f32 %v6886_v62, %v3761_v16  ;;  %v3763_v31 = vpop.f32.mrb[151].mxu1 }
 0x406   :  { %v3784_v3 = vpack.c.bf16 %v3762_v13, %v3759_v21 }
 0x408   :  { %v3797_v5 = vmax.bf16 %v7269_v17, %v3784_v3 }
 0x409   :  { %v3766_v55 = vpop.f32.mrb[152].mxu1 }
 0x40a   :  { %v3767_v34 = vadd.f32 %v6888_v2, %v3766_v55  ;;  %v3768_v26 = vpop.f32.mrb[153].mxu1  ;;  %3851 = vmatpush1.bf16.msra.mxu1 %v3797_v5 }
 0x40b   :  { %v3769_v53 = vpop.f32.mrb[154].mxu1  ;;  %3852 = vmatprep.subr.bf16.mxu1 %v7269_v17 }
 0x40c   :  { %v3770_v33 = vadd.f32 %v6890_v18, %v3769_v53  ;;  %v3771_v57 = vpop.f32.mrb[155].mxu1 }
 0x40e   :  { %v3785_v22 = vpack.c.bf16 %v3770_v33, %v3767_v34 }
 0x410   :  { %v3798_v41 = vmax.bf16 %v7269_v17, %v3785_v22 }
 0x412   :  { %3853 = vmatpush1.bf16.msra.mxu1 %v3798_v41 }
 0x415   :  { %3861 = vmatmul.mubr.bf16.vlgmr.msra.gmra.mrb[156].mxu1 %v3815_v1 }
 0x4e8   :  { %v3862_v62 = vpop.f32.mrb[156].mxu1 }
 0x4e9   :  { %3869 = vst.msk [vmem:[#allocation2] sm:$0x1] %vm3868_vm3, %v3862_v62  ;;  %v3864_v2 = vpop.f32.mrb[157].mxu1 }
 0x4ea   :  { %v3865_v25 = vpop.f32.mrb[158].mxu1 }
 0x4eb   :  { %5199 = shalt.err (!%p5196_p4)
}
 0x4ec   :  { %s5200_s14 = scalar_lea.hbm %s6963_s5, 16 }
 0x4ed   :  { %p5201_p5 = scmp.ne.s32.totalorder %s6963_s5, %s5200_s14  ;;  %p5204_p6 = scmp.lt.u32.totalorder %s5200_s14, %s6963_s5 }
 0x4ef   :  { %p5206_p7 = pnand %p5204_p6, %p5201_p5 }
 0x4f1   :  { %5209 = shalt.err (!%p5206_p7)
}
 0x4f2   :  { %3879 = dma.vmem_to_hbm [thread:$0]  %s3877_s9, 16, %s6963_s5, [#allocation3]   ;;  %v3866_v17 = vpop.f32.mrb[159].mxu1 }
 0x4f3   :  { %5210 = dma.done.wait [#allocation3], 16  }
 0x4f4   :  { %5211 = vsyncadd [#allocation3], 4294967280 }
 0x4f5   :  { %3883 = vsyncpa [#allocation3], 1 }

</bundles_post_ra>
